<compile_context>
chip_gen: v7x
topology: tpu7x:2x2x1
jax: 0.10.0
libtpu: 0.0.40
codegen_flags: <defaults>
</compile_context>

<pallas_src>
import math
import functools

import jax
import jax.numpy as jnp
from jax.experimental import pallas as pl
from jax.experimental.pallas import tpu as pltpu


def _round_up(v: int, m: int) -> int:
    return ((v + m - 1) // m) * m


# -----------------------------------------------------------------------------
# Pallas kernel: fc1 + depthwise 3x3 conv + GELU + fc2, fused per row block
# -----------------------------------------------------------------------------
def _mlp_kernel(H, W, RB, tap_dtype, x_ref, w1_ref, b1_ref, dww_ref, dwb_ref,
                w2_ref, b2_ref, o_ref, pad_ref):
    Ch = w1_ref.shape[1]                      # padded hidden dim (lane-dense)
    r = pl.program_id(1)
    nrb = pl.num_programs(1)

    w1 = w1_ref[...]                          # (Cin, Ch) bf16
    b1 = b1_ref[...]                          # (1, Ch)   f32

    # ---- fc1 for this row block: (RB*W, Cin) @ (Cin, Ch), f32 accumulate ----
    tok0 = pl.multiple_of(r * (RB * W), RB * W)
    xb = x_ref[0, pl.ds(tok0, RB * W), :]
    h = jnp.dot(xb, w1, preferred_element_type=jnp.float32) + b1   # (RB*W, Ch)

    # ---- stage into padded scratch; zero ONLY the halo border ----
    zrow = jnp.zeros((1, W + 2, Ch), tap_dtype)
    pad_ref[0:1] = zrow
    pad_ref[RB + 1:RB + 2] = zrow
    zcol = jnp.zeros((RB, 1, Ch), tap_dtype)
    pad_ref[1:RB + 1, 0:1, :] = zcol
    pad_ref[1:RB + 1, W + 1:W + 2, :] = zcol
    pad_ref[1:RB + 1, 1:W + 1, :] = h.reshape(RB, W, Ch).astype(tap_dtype)

    # ---- halo rows: recompute fc1 for one image row above / below ----
    @pl.when(r > 0)
    def _():
        t = pl.multiple_of((r * RB - 1) * W, W)
        hh = jnp.dot(x_ref[0, pl.ds(t, W), :], w1,
                     preferred_element_type=jnp.float32) + b1
        pad_ref[0:1, 1:W + 1, :] = hh.reshape(1, W, Ch).astype(tap_dtype)

    @pl.when(r < nrb - 1)
    def _():
        t = pl.multiple_of((r + 1) * (RB * W), W)
        hh = jnp.dot(x_ref[0, pl.ds(t, W), :], w1,
                     preferred_element_type=jnp.float32) + b1
        pad_ref[RB + 1:RB + 2, 1:W + 1, :] = hh.reshape(1, W, Ch).astype(tap_dtype)

    # ---- depthwise 3x3 conv (9 static taps); accumulator seeded with bias ----
    pb = pad_ref[...]                         # (RB+2, W+2, Ch), tap_dtype
    dw_w = dww_ref[...]                       # (9, Ch), tap_dtype
    y = jnp.broadcast_to(dwb_ref[...].reshape(1, 1, Ch), (RB, W, Ch))
    for k in range(9):                        # static unroll
        di, dj = k // 3, k % 3
        y = y + pb[di:di + RB, dj:dj + W, :] * dw_w[k].reshape(1, 1, Ch)

    # ---- GELU (exact erf; torch.nn.GELU default) in f32 ----
    y = y.astype(jnp.float32)
    y = 0.5 * y * (1.0 + jax.lax.erf(y * 0.7071067811865476))
    # Dropout(p=0.0) / eval mode is the identity.

    # ---- fc2: (RB*W, Ch) @ (Ch, Cout), f32 accumulate ----
    out = jnp.dot(y.reshape(RB * W, Ch).astype(jnp.bfloat16), w2_ref[...],
                  preferred_element_type=jnp.float32)
    o_ref[0] = (out + b2_ref[...]).astype(o_ref.dtype)


# -----------------------------------------------------------------------------
# Per-generation knobs
# -----------------------------------------------------------------------------
def _vmem_capacity_bytes() -> int:
    try:
        return int(pltpu.get_tpu_info().vmem_capacity_bytes)
    except Exception:
        return 64 * 1024 * 1024          # conservative (v7x per-TensorCore VMEM)


def _tap_dtype():
    try:
        kind = jax.devices()[0].device_kind.lower()
    except Exception:
        return jnp.float32
    # bf16 VPU exists on v6e/v7x; keep f32 tap math elsewhere (e.g. v5e).
    return jnp.bfloat16 if ("v6" in kind or "v7" in kind) else jnp.float32


def _pick_row_block(H, W, N, Cin_p, Ch_p, Cout_p, tap_bytes, budget):
    fixed = ((Cin_p * Ch_p + Ch_p * Cout_p) * 2        # bf16 weights (single-buffered)
             + (2 * Ch_p + Cout_p) * 4                 # biases
             + 9 * Ch_p * 4                            # dwconv taps
             + 2 * N * Cin_p * 2)                      # double-buffered input tokens (bf16)

    def per_block(rb):
        pad = (rb + 2) * _round_up(W + 2, 8) * Ch_p * tap_bytes
        out_blk = 2 * rb * W * Cout_p * 4              # double-buffered output block
        live = 3 * rb * W * Ch_p * 4                   # fc1 / conv / GELU intermediates
        return pad + out_blk + live

    cands = [d for d in range(1, H + 1)
             if H % d == 0 and ((d * W) % 8 == 0 or d == H)]
    for d in sorted(cands, reverse=True):
        if fixed + per_block(d) <= budget:
            return d
    small = [d for d in cands if d < H]
    # TODO(synk): even the smallest row block may overflow VMEM for extreme
    #             shapes; that case needs column tiling as well.
    return min(small) if small else H


# -----------------------------------------------------------------------------
# Wrapper: pad feature dims to lane multiples, cast GEMM operands to bf16
# -----------------------------------------------------------------------------
def mlp_forward(x, w1, b1, dw_w, dw_b, w2, b2, *, H, W, row_block=None):
    """Segformer Mlp forward.

    x:    (B, N, Cin), N == H*W                (torch: x)
    w1:   (hidden, Cin),  b1: (hidden,)        (torch: fc1.weight / fc1.bias)
    dw_w: (hidden, 1, 3, 3), dw_b: (hidden,)   (torch: dwconv.dwconv.weight/bias)
    w2:   (Cout, hidden), b2: (Cout,)          (torch: fc2.weight / fc2.bias)
    Returns (B, N, Cout) float32.
    """
    B, N, Cin = x.shape
    hidden = w1.shape[0]
    Cout = w2.shape[0]
    assert N == H * W

    LANE = 128
    Cin_p = _round_up(Cin, LANE)
    Ch_p = _round_up(hidden, LANE)
    Cout_p = _round_up(Cout, LANE)

    tap_dtype = _tap_dtype()
    tap_bytes = 2 if tap_dtype == jnp.bfloat16 else 4
    vmem_cap = _vmem_capacity_bytes()

    if row_block is None:
        RB = _pick_row_block(H, W, N, Cin_p, Ch_p, Cout_p, tap_bytes,
                             int(0.55 * vmem_cap))
    else:
        RB = row_block
        assert H % RB == 0 and ((RB * W) % 8 == 0 or RB == H)
    nrb = H // RB

    # Zero-pad feature dims; bf16 for matmul operands, tap_dtype for conv staging.
    xp = jnp.pad(x, ((0, 0), (0, 0), (0, Cin_p - Cin))).astype(jnp.bfloat16)
    w1p = jnp.pad(w1.T, ((0, Cin_p - Cin), (0, Ch_p - hidden))).astype(jnp.bfloat16)
    b1p = jnp.pad(b1, (0, Ch_p - hidden)).reshape(1, Ch_p).astype(jnp.float32)
    dwwp = jnp.pad(dw_w.reshape(hidden, 9).T,
                   ((0, 0), (0, Ch_p - hidden))).astype(tap_dtype)     # (9, Ch_p)
    dwbp = jnp.pad(dw_b, (0, Ch_p - hidden)).reshape(1, Ch_p).astype(tap_dtype)
    w2p = jnp.pad(w2.T, ((0, Ch_p - hidden), (0, Cout_p - Cout))).astype(jnp.bfloat16)
    b2p = jnp.pad(b2, (0, Cout_p - Cout)).reshape(1, Cout_p).astype(jnp.float32)

    flops = (B * (N + 2 * (nrb - 1) * W) * 2 * Cin_p * Ch_p
             + B * N * (2 * Ch_p * Cout_p + 20 * Ch_p))
    bytes_accessed = (B * N * Cin_p * 2 + Cin_p * Ch_p * 2 + Ch_p * 4
                      + 10 * Ch_p * tap_bytes
                      + Ch_p * Cout_p * 2 + Cout_p * 4
                      + B * N * Cout_p * 4)

    kernel = functools.partial(_mlp_kernel, H, W, RB, tap_dtype)

    def build(single_buffer_weights):
        const = ({"pipeline_mode": pl.Buffered(1)}
                 if single_buffer_weights else {})
        in_specs = [
            pl.BlockSpec((1, N, Cin_p), lambda b, r: (b, 0, 0)),        # all tokens of image b
            pl.BlockSpec((Cin_p, Ch_p), lambda b, r: (0, 0), **const),  # fc1 weight
            pl.BlockSpec((1, Ch_p), lambda b, r: (0, 0), **const),      # fc1 bias
            pl.BlockSpec((9, Ch_p), lambda b, r: (0, 0), **const),      # dwconv weight
            pl.BlockSpec((1, Ch_p), lambda b, r: (0, 0), **const),      # dwconv bias
            pl.BlockSpec((Ch_p, Cout_p), lambda b, r: (0, 0), **const), # fc2 weight
            pl.BlockSpec((1, Cout_p), lambda b, r: (0, 0), **const),    # fc2 bias
        ]
        return pl.pallas_call(
            kernel,
            out_shape=jax.ShapeDtypeStruct((B, N, Cout_p), jnp.float32),
            grid=(B, nrb),
            in_specs=in_specs,
            out_specs=pl.BlockSpec((1, RB * W, Cout_p), lambda b, r: (b, r, 0)),
            scratch_shapes=[pltpu.VMEM((RB + 2, W + 2, Ch_p), tap_dtype)],
            compiler_params=pltpu.CompilerParams(
                dimension_semantics=("parallel", "parallel"),
                vmem_limit_bytes=min(int(0.9 * vmem_cap), 112 * 1024 * 1024)),
            cost_estimate=pl.CostEstimate(
                flops=flops,
                transcendentals=B * N * Ch_p,
                bytes_accessed=bytes_accessed),
        )

    args = (xp, w1p, b1p, dwwp, dwbp, w2p, b2p)
    try:
        out = build(True)(*args)
    except Exception:
        # Fallback if this JAX build rejects single-buffered (Buffered(1)) blocks.
        out = build(False)(*args)

    return out[:, :, :Cout]


# -----------------------------------------------------------------------------
# Deterministic parameter init (mirrors the module's _init_weights)
# -----------------------------------------------------------------------------
def init_params(key, in_features, hidden_features, out_features):
    k1, k2, k3 = jax.random.split(key, 3)
    w1 = 0.02 * jax.random.truncated_normal(
        k1, -2.0, 2.0, (hidden_features, in_features), jnp.float32)
    b1 = jnp.zeros((hidden_features,), jnp.float32)
    # depthwise Conv2d: fan_out = 3*3*hidden // groups(=hidden) = 9
    std = math.sqrt(2.0 / 9.0)
    dw_w = std * jax.random.normal(k2, (hidden_features, 1, 3, 3), jnp.float32)
    dw_b = jnp.zeros((hidden_features,), jnp.float32)
    w2 = 0.02 * jax.random.truncated_normal(
        k3, -2.0, 2.0, (out_features, hidden_features), jnp.float32)
    b2 = jnp.zeros((out_features,), jnp.float32)
    return w1, b1, dw_w, dw_b, w2, b2


# -----------------------------------------------------------------------------
# Pure-JAX f32 reference (silent correctness check)
# -----------------------------------------------------------------------------
def _reference(x, w1, b1, dw_w, dw_b, w2, b2, *, H, W):
    B, N, _ = x.shape
    hidden = w1.shape[0]
    h = x @ w1.T + b1                                    # (B, N, hidden)
    himg = h.transpose(0, 2, 1).reshape(B, hidden, H, W)
    y = jax.lax.conv_general_dilated(
        himg, dw_w, window_strides=(1, 1), padding=((1, 1), (1, 1)),
        dimension_numbers=("NCHW", "OIHW", "NCHW"),
        feature_group_count=hidden)
    y = y + dw_b[None, :, None, None]
    y = y.reshape(B, hidden, N).transpose(0, 2, 1)       # (B, N, hidden)
    y = 0.5 * y * (1.0 + jax.lax.erf(y * 0.7071067811865476))
    return y @ w2.T + b2                                 # (B, N, Cout)


if __name__ == "__main__":
    # Small config consistent with the module: tokens of an 8x8 feature map.
    B, H, W = 2, 8, 8
    N = H * W
    in_features, hidden_features, out_features = 32, 64, 32

    key = jax.random.PRNGKey(0)
    kx, kp = jax.random.split(key)
    x = jax.random.normal(kx, (B, N, in_features), jnp.float32)
    params = init_params(kp, in_features, hidden_features, out_features)

    ref = _reference(x, *params, H=H, W=W)

    # Forced multi-row-block path (exercises the 1-row halo / pl.when logic).
    out_tiled = jax.block_until_ready(
        mlp_forward(x, *params, H=H, W=W, row_block=2))
    # Auto-sized path (whole image per step at this small size).
    out_auto = jax.block_until_ready(mlp_forward(x, *params, H=H, W=W))

    assert out_tiled.shape == (B, N, out_features)
    # bf16 GEMM inputs / bf16 tap staging (f32 accumulation in GEMMs) vs f32 ref
    assert jnp.allclose(out_tiled, ref, atol=1e-2, rtol=1e-2), \
        float(jnp.max(jnp.abs(out_tiled - ref)))
    assert jnp.allclose(out_auto, ref, atol=1e-2, rtol=1e-2), \
        float(jnp.max(jnp.abs(out_auto - ref)))

    print("KERNEL_OK")
</pallas_src>

<mosaic_0001>
module attributes {stable_mosaic.version = 11 : i64} {
  func.func @_mlp_kernel(%arg0: i32, %arg1: i32, %arg2: memref<1x64x128xbf16, #tpu.memory_space<vmem>>, %arg3: memref<128x128xbf16, #tpu.memory_space<vmem>>, %arg4: memref<1x128xf32, #tpu.memory_space<vmem>>, %arg5: memref<9x128xf32, #tpu.memory_space<vmem>>, %arg6: memref<1x128xf32, #tpu.memory_space<vmem>>, %arg7: memref<128x128xbf16, #tpu.memory_space<vmem>>, %arg8: memref<1x128xf32, #tpu.memory_space<vmem>>, %arg9: memref<1x16x128xf32, #tpu.memory_space<vmem>>, %arg10: memref<4x10x128xf32, #tpu.memory_space<vmem>>) attributes {dimension_semantics = [#tpu.dimension_semantics<parallel>, #tpu.dimension_semantics<parallel>], iteration_bounds = array<i64: 2, 4>, scalar_prefetch = 0 : i64, scratch_operands = 1 : i64, tpu.core_type = #tpu.core_type<tc>, window_params = [{transform_indices = @transform_0, window_bounds = array<i64: 1, 64, 128>}, {pipeline_mode = #tpu.pipeline_mode<synchronous>, transform_indices = @transform_1, window_bounds = array<i64: 128, 128>}, {pipeline_mode = #tpu.pipeline_mode<synchronous>, transform_indices = @transform_2, window_bounds = array<i64: 1, 128>}, {pipeline_mode = #tpu.pipeline_mode<synchronous>, transform_indices = @transform_3, window_bounds = array<i64: 9, 128>}, {pipeline_mode = #tpu.pipeline_mode<synchronous>, transform_indices = @transform_4, window_bounds = array<i64: 1, 128>}, {pipeline_mode = #tpu.pipeline_mode<synchronous>, transform_indices = @transform_5, window_bounds = array<i64: 128, 128>}, {pipeline_mode = #tpu.pipeline_mode<synchronous>, transform_indices = @transform_6, window_bounds = array<i64: 1, 128>}, {transform_indices = @transform_7, window_bounds = array<i64: 1, 16, 128>}]} {
    %c0 = arith.constant 0 : index
    %c0_0 = arith.constant 0 : index
    %0 = vector.load %arg3[%c0, %c0_0] : memref<128x128xbf16, #tpu.memory_space<vmem>>, vector<128x128xbf16>
    %c0_1 = arith.constant 0 : index
    %c0_2 = arith.constant 0 : index
    %1 = vector.load %arg4[%c0_1, %c0_2] : memref<1x128xf32, #tpu.memory_space<vmem>>, vector<1x128xf32>
    %c16_i32 = arith.constant 16 : i32
    %2 = arith.muli %arg1, %c16_i32 : i32
    %3 = tpu.assume_multiple %2, 16 : i32
    %c0_3 = arith.constant 0 : index
    %4 = arith.index_cast %3 : i32 to index
    %c0_4 = arith.constant 0 : index
    %5 = vector.load %arg2[%c0_3, %4, %c0_4] : memref<1x64x128xbf16, #tpu.memory_space<vmem>>, vector<1x16x128xbf16>
    %6 = vector.shape_cast %5 : vector<1x16x128xbf16> to vector<16x128xbf16>
    %cst = arith.constant dense<0.000000e+00> : vector<16x128xf32>
    %7 = tpu.matmul %6, %0, %cst {dimension_numbers = #tpu.dot_dimension_numbers<[1], [0], [0], [1], [0, 0, 1, 1], [], []>} : vector<16x128xbf16>, vector<128x128xbf16>, vector<16x128xf32> -> vector<16x128xf32>
    %8 = vector.broadcast %1 : vector<1x128xf32> to vector<16x128xf32>
    %9 = arith.addf %7, %8 : vector<16x128xf32>
    %cst_5 = arith.constant 0.000000e+00 : f32
    %10 = vector.broadcast %cst_5 : f32 to vector<1x10x128xf32>
    %c0_6 = arith.constant 0 : index
    %c0_7 = arith.constant 0 : index
    %c0_8 = arith.constant 0 : index
    %11 = vector.load %arg10[%c0_6, %c0_7, %c0_8] : memref<4x10x128xf32, #tpu.memory_space<vmem>>, vector<1x10x128xf32>
    tpu.vector_store %arg10[%c0_6, %c0_7, %c0_8], %10 {strides = array<i32>} : memref<4x10x128xf32, #tpu.memory_space<vmem>>, vector<1x10x128xf32>,
    %c3 = arith.constant 3 : index
    %c0_9 = arith.constant 0 : index
    %c0_10 = arith.constant 0 : index
    %12 = vector.load %arg10[%c3, %c0_9, %c0_10] : memref<4x10x128xf32, #tpu.memory_space<vmem>>, vector<1x10x128xf32>
    tpu.vector_store %arg10[%c3, %c0_9, %c0_10], %10 {strides = array<i32>} : memref<4x10x128xf32, #tpu.memory_space<vmem>>, vector<1x10x128xf32>,
    %cst_11 = arith.constant 0.000000e+00 : f32
    %13 = vector.broadcast %cst_11 : f32 to vector<2x1x128xf32>
    %c1 = arith.constant 1 : index
    %c0_12 = arith.constant 0 : index
    %c0_13 = arith.constant 0 : index
    %14 = vector.load %arg10[%c1, %c0_12, %c0_13] : memref<4x10x128xf32, #tpu.memory_space<vmem>>, vector<2x1x128xf32>
    tpu.vector_store %arg10[%c1, %c0_12, %c0_13], %13 {strides = array<i32>} : memref<4x10x128xf32, #tpu.memory_space<vmem>>, vector<2x1x128xf32>,
    %c1_14 = arith.constant 1 : index
    %c9 = arith.constant 9 : index
    %c0_15 = arith.constant 0 : index
    %15 = vector.load %arg10[%c1_14, %c9, %c0_15] : memref<4x10x128xf32, #tpu.memory_space<vmem>>, vector<2x1x128xf32>
    tpu.vector_store %arg10[%c1_14, %c9, %c0_15], %13 {strides = array<i32>} : memref<4x10x128xf32, #tpu.memory_space<vmem>>, vector<2x1x128xf32>,
    %16 = vector.shape_cast %9 : vector<16x128xf32> to vector<2x8x128xf32>
    %c1_16 = arith.constant 1 : index
    %c1_17 = arith.constant 1 : index
    %c0_18 = arith.constant 0 : index
    %17 = vector.load %arg10[%c1_16, %c1_17, %c0_18] : memref<4x10x128xf32, #tpu.memory_space<vmem>>, vector<2x8x128xf32>
    tpu.vector_store %arg10[%c1_16, %c1_17, %c0_18], %16 {strides = array<i32>} : memref<4x10x128xf32, #tpu.memory_space<vmem>>, vector<2x8x128xf32>,
    %c0_i32 = arith.constant 0 : i32
    %18 = arith.cmpi sgt, %arg1, %c0_i32 : i32
    %19 = arith.extui %18 : i1 to i32
    %c0_i32_19 = arith.constant 0 : i32
    %20 = arith.cmpi ne, %19, %c0_i32_19 : i32
    scf.if %20 {
      %c2_i32 = arith.constant 2 : i32
      %111 = arith.muli %arg1, %c2_i32 : i32
      %c1_i32 = arith.constant 1 : i32
      %112 = arith.subi %111, %c1_i32 : i32
      %c8_i32 = arith.constant 8 : i32
      %113 = arith.muli %112, %c8_i32 : i32
      %114 = tpu.assume_multiple %113, 8 : i32
      %c0_39 = arith.constant 0 : index
      %115 = arith.index_cast %114 : i32 to index
      %c0_40 = arith.constant 0 : index
      %116 = vector.load %arg2[%c0_39, %115, %c0_40] : memref<1x64x128xbf16, #tpu.memory_space<vmem>>, vector<1x8x128xbf16>
      %117 = vector.shape_cast %116 : vector<1x8x128xbf16> to vector<8x128xbf16>
      %cst_41 = arith.constant dense<0.000000e+00> : vector<8x128xf32>
      %118 = tpu.matmul %117, %0, %cst_41 {dimension_numbers = #tpu.dot_dimension_numbers<[1], [0], [0], [1], [0, 0, 1, 1], [], []>} : vector<8x128xbf16>, vector<128x128xbf16>, vector<8x128xf32> -> vector<8x128xf32>
      %119 = vector.broadcast %1 : vector<1x128xf32> to vector<8x128xf32>
      %120 = arith.addf %118, %119 : vector<8x128xf32>
      %121 = vector.shape_cast %120 : vector<8x128xf32> to vector<1x8x128xf32>
      %c0_42 = arith.constant 0 : index
      %c1_43 = arith.constant 1 : index
      %c0_44 = arith.constant 0 : index
      %122 = vector.load %arg10[%c0_42, %c1_43, %c0_44] : memref<4x10x128xf32, #tpu.memory_space<vmem>>, vector<1x8x128xf32>
      tpu.vector_store %arg10[%c0_42, %c1_43, %c0_44], %121 {strides = array<i32>} : memref<4x10x128xf32, #tpu.memory_space<vmem>>, vector<1x8x128xf32>,
    } else {
    }
    %c3_i32 = arith.constant 3 : i32
    %21 = arith.cmpi slt, %arg1, %c3_i32 : i32
    %22 = arith.extui %21 : i1 to i32
    %c0_i32_20 = arith.constant 0 : i32
    %23 = arith.cmpi ne, %22, %c0_i32_20 : i32
    scf.if %23 {
      %c1_i32 = arith.constant 1 : i32
      %111 = arith.addi %arg1, %c1_i32 : i32
      %c16_i32_39 = arith.constant 16 : i32
      %112 = arith.muli %111, %c16_i32_39 : i32
      %113 = tpu.assume_multiple %112, 8 : i32
      %c0_40 = arith.constant 0 : index
      %114 = arith.index_cast %113 : i32 to index
      %c0_41 = arith.constant 0 : index
      %115 = vector.load %arg2[%c0_40, %114, %c0_41] : memref<1x64x128xbf16, #tpu.memory_space<vmem>>, vector<1x8x128xbf16>
      %116 = vector.shape_cast %115 : vector<1x8x128xbf16> to vector<8x128xbf16>
      %cst_42 = arith.constant dense<0.000000e+00> : vector<8x128xf32>
      %117 = tpu.matmul %116, %0, %cst_42 {dimension_numbers = #tpu.dot_dimension_numbers<[1], [0], [0], [1], [0, 0, 1, 1], [], []>} : vector<8x128xbf16>, vector<128x128xbf16>, vector<8x128xf32> -> vector<8x128xf32>
      %118 = vector.broadcast %1 : vector<1x128xf32> to vector<8x128xf32>
      %119 = arith.addf %117, %118 : vector<8x128xf32>
      %120 = vector.shape_cast %119 : vector<8x128xf32> to vector<1x8x128xf32>
      %c3_43 = arith.constant 3 : index
      %c1_44 = arith.constant 1 : index
      %c0_45 = arith.constant 0 : index
      %121 = vector.load %arg10[%c3_43, %c1_44, %c0_45] : memref<4x10x128xf32, #tpu.memory_space<vmem>>, vector<1x8x128xf32>
      tpu.vector_store %arg10[%c3_43, %c1_44, %c0_45], %120 {strides = array<i32>} : memref<4x10x128xf32, #tpu.memory_space<vmem>>, vector<1x8x128xf32>,
    } else {
    }
    %c0_21 = arith.constant 0 : index
    %c0_22 = arith.constant 0 : index
    %c0_23 = arith.constant 0 : index
    %24 = vector.load %arg10[%c0_21, %c0_22, %c0_23] : memref<4x10x128xf32, #tpu.memory_space<vmem>>, vector<4x10x128xf32>
    %c0_24 = arith.constant 0 : index
    %c0_25 = arith.constant 0 : index
    %25 = vector.load %arg5[%c0_24, %c0_25] : memref<9x128xf32, #tpu.memory_space<vmem>>, vector<9x128xf32>
    %c0_26 = arith.constant 0 : index
    %c0_27 = arith.constant 0 : index
    %26 = vector.load %arg6[%c0_26, %c0_27] : memref<1x128xf32, #tpu.memory_space<vmem>>, vector<1x128xf32>
    %27 = vector.shape_cast %26 : vector<1x128xf32> to vector<1x1x128xf32>
    %28 = vector.shape_cast %27 : vector<1x1x128xf32> to vector<1x1x128xf32>
    %29 = vector.broadcast %28 : vector<1x1x128xf32> to vector<2x8x128xf32>
    %30 = vector.extract_strided_slice %24 {offsets = [0, 0, 0], sizes = [2, 8, 128], strides = [1, 1, 1]} : vector<4x10x128xf32> to vector<2x8x128xf32>
    %31 = vector.extract_strided_slice %25 {offsets = [0, 0], sizes = [1, 128], strides = [1, 1]} : vector<9x128xf32> to vector<1x128xf32>
    %32 = vector.shape_cast %31 : vector<1x128xf32> to vector<128xf32>
    %33 = vector.shape_cast %32 : vector<128xf32> to vector<1x1x128xf32>
    %34 = vector.broadcast %33 : vector<1x1x128xf32> to vector<2x8x128xf32>
    %35 = arith.mulf %30, %34 : vector<2x8x128xf32>
    %36 = arith.addf %29, %35 : vector<2x8x128xf32>
    %37 = vector.extract_strided_slice %24 {offsets = [0, 1, 0], sizes = [2, 8, 128], strides = [1, 1, 1]} : vector<4x10x128xf32> to vector<2x8x128xf32>
    %38 = vector.extract_strided_slice %25 {offsets = [1, 0], sizes = [1, 128], strides = [1, 1]} : vector<9x128xf32> to vector<1x128xf32>
    %39 = vector.shape_cast %38 : vector<1x128xf32> to vector<128xf32>
    %40 = vector.shape_cast %39 : vector<128xf32> to vector<1x1x128xf32>
    %41 = vector.broadcast %40 : vector<1x1x128xf32> to vector<2x8x128xf32>
    %42 = arith.mulf %37, %41 : vector<2x8x128xf32>
    %43 = arith.addf %36, %42 : vector<2x8x128xf32>
    %44 = vector.extract_strided_slice %24 {offsets = [0, 2, 0], sizes = [2, 8, 128], strides = [1, 1, 1]} : vector<4x10x128xf32> to vector<2x8x128xf32>
    %45 = vector.extract_strided_slice %25 {offsets = [2, 0], sizes = [1, 128], strides = [1, 1]} : vector<9x128xf32> to vector<1x128xf32>
    %46 = vector.shape_cast %45 : vector<1x128xf32> to vector<128xf32>
    %47 = vector.shape_cast %46 : vector<128xf32> to vector<1x1x128xf32>
    %48 = vector.broadcast %47 : vector<1x1x128xf32> to vector<2x8x128xf32>
    %49 = arith.mulf %44, %48 : vector<2x8x128xf32>
    %50 = arith.addf %43, %49 : vector<2x8x128xf32>
    %51 = vector.extract_strided_slice %24 {offsets = [1, 0, 0], sizes = [2, 8, 128], strides = [1, 1, 1]} : vector<4x10x128xf32> to vector<2x8x128xf32>
    %52 = vector.extract_strided_slice %25 {offsets = [3, 0], sizes = [1, 128], strides = [1, 1]} : vector<9x128xf32> to vector<1x128xf32>
    %53 = vector.shape_cast %52 : vector<1x128xf32> to vector<128xf32>
    %54 = vector.shape_cast %53 : vector<128xf32> to vector<1x1x128xf32>
    %55 = vector.broadcast %54 : vector<1x1x128xf32> to vector<2x8x128xf32>
    %56 = arith.mulf %51, %55 : vector<2x8x128xf32>
    %57 = arith.addf %50, %56 : vector<2x8x128xf32>
    %58 = vector.extract_strided_slice %24 {offsets = [1, 1, 0], sizes = [2, 8, 128], strides = [1, 1, 1]} : vector<4x10x128xf32> to vector<2x8x128xf32>
    %59 = vector.extract_strided_slice %25 {offsets = [4, 0], sizes = [1, 128], strides = [1, 1]} : vector<9x128xf32> to vector<1x128xf32>
    %60 = vector.shape_cast %59 : vector<1x128xf32> to vector<128xf32>
    %61 = vector.shape_cast %60 : vector<128xf32> to vector<1x1x128xf32>
    %62 = vector.broadcast %61 : vector<1x1x128xf32> to vector<2x8x128xf32>
    %63 = arith.mulf %58, %62 : vector<2x8x128xf32>
    %64 = arith.addf %57, %63 : vector<2x8x128xf32>
    %65 = vector.extract_strided_slice %24 {offsets = [1, 2, 0], sizes = [2, 8, 128], strides = [1, 1, 1]} : vector<4x10x128xf32> to vector<2x8x128xf32>
    %66 = vector.extract_strided_slice %25 {offsets = [5, 0], sizes = [1, 128], strides = [1, 1]} : vector<9x128xf32> to vector<1x128xf32>
    %67 = vector.shape_cast %66 : vector<1x128xf32> to vector<128xf32>
    %68 = vector.shape_cast %67 : vector<128xf32> to vector<1x1x128xf32>
    %69 = vector.broadcast %68 : vector<1x1x128xf32> to vector<2x8x128xf32>
    %70 = arith.mulf %65, %69 : vector<2x8x128xf32>
    %71 = arith.addf %64, %70 : vector<2x8x128xf32>
    %72 = vector.extract_strided_slice %24 {offsets = [2, 0, 0], sizes = [2, 8, 128], strides = [1, 1, 1]} : vector<4x10x128xf32> to vector<2x8x128xf32>
    %73 = vector.extract_strided_slice %25 {offsets = [6, 0], sizes = [1, 128], strides = [1, 1]} : vector<9x128xf32> to vector<1x128xf32>
    %74 = vector.shape_cast %73 : vector<1x128xf32> to vector<128xf32>
    %75 = vector.shape_cast %74 : vector<128xf32> to vector<1x1x128xf32>
    %76 = vector.broadcast %75 : vector<1x1x128xf32> to vector<2x8x128xf32>
    %77 = arith.mulf %72, %76 : vector<2x8x128xf32>
    %78 = arith.addf %71, %77 : vector<2x8x128xf32>
    %79 = vector.extract_strided_slice %24 {offsets = [2, 1, 0], sizes = [2, 8, 128], strides = [1, 1, 1]} : vector<4x10x128xf32> to vector<2x8x128xf32>
    %80 = vector.extract_strided_slice %25 {offsets = [7, 0], sizes = [1, 128], strides = [1, 1]} : vector<9x128xf32> to vector<1x128xf32>
    %81 = vector.shape_cast %80 : vector<1x128xf32> to vector<128xf32>
    %82 = vector.shape_cast %81 : vector<128xf32> to vector<1x1x128xf32>
    %83 = vector.broadcast %82 : vector<1x1x128xf32> to vector<2x8x128xf32>
    %84 = arith.mulf %79, %83 : vector<2x8x128xf32>
    %85 = arith.addf %78, %84 : vector<2x8x128xf32>
    %86 = vector.extract_strided_slice %24 {offsets = [2, 2, 0], sizes = [2, 8, 128], strides = [1, 1, 1]} : vector<4x10x128xf32> to vector<2x8x128xf32>
    %87 = vector.extract_strided_slice %25 {offsets = [8, 0], sizes = [1, 128], strides = [1, 1]} : vector<9x128xf32> to vector<1x128xf32>
    %88 = vector.shape_cast %87 : vector<1x128xf32> to vector<128xf32>
    %89 = vector.shape_cast %88 : vector<128xf32> to vector<1x1x128xf32>
    %90 = vector.broadcast %89 : vector<1x1x128xf32> to vector<2x8x128xf32>
    %91 = arith.mulf %86, %90 : vector<2x8x128xf32>
    %92 = arith.addf %85, %91 : vector<2x8x128xf32>
    %cst_28 = arith.constant 5.000000e-01 : f32
    %93 = vector.broadcast %cst_28 : f32 to vector<2x8x128xf32>
    %94 = arith.mulf %93, %92 : vector<2x8x128xf32>
    %cst_29 = arith.constant 0.707106769 : f32
    %95 = vector.broadcast %cst_29 : f32 to vector<2x8x128xf32>
    %96 = arith.mulf %92, %95 : vector<2x8x128xf32>
    %97 = math.erf %96 : vector<2x8x128xf32>
    %cst_30 = arith.constant 1.000000e+00 : f32
    %98 = vector.broadcast %cst_30 : f32 to vector<2x8x128xf32>
    %99 = arith.addf %98, %97 : vector<2x8x128xf32>
    %100 = arith.mulf %94, %99 : vector<2x8x128xf32>
    %101 = vector.shape_cast %100 : vector<2x8x128xf32> to vector<16x128xf32>
    %102 = arith.truncf %101 : vector<16x128xf32> to vector<16x128xbf16>
    %c0_31 = arith.constant 0 : index
    %c0_32 = arith.constant 0 : index
    %103 = vector.load %arg7[%c0_31, %c0_32] : memref<128x128xbf16, #tpu.memory_space<vmem>>, vector<128x128xbf16>
    %cst_33 = arith.constant dense<0.000000e+00> : vector<16x128xf32>
    %104 = tpu.matmul %102, %103, %cst_33 {dimension_numbers = #tpu.dot_dimension_numbers<[1], [0], [0], [1], [0, 0, 1, 1], [], []>} : vector<16x128xbf16>, vector<128x128xbf16>, vector<16x128xf32> -> vector<16x128xf32>
    %c0_34 = arith.constant 0 : index
    %c0_35 = arith.constant 0 : index
    %105 = vector.load %arg8[%c0_34, %c0_35] : memref<1x128xf32, #tpu.memory_space<vmem>>, vector<1x128xf32>
    %106 = vector.broadcast %105 : vector<1x128xf32> to vector<16x128xf32>
    %107 = arith.addf %104, %106 : vector<16x128xf32>
    %c0_36 = arith.constant 0 : index
    %c0_37 = arith.constant 0 : index
    %c0_38 = arith.constant 0 : index
    %108 = vector.load %arg9[%c0_36, %c0_37, %c0_38] : memref<1x16x128xf32, #tpu.memory_space<vmem>>, vector<1x16x128xf32>
    %109 = vector.shape_cast %108 : vector<1x16x128xf32> to vector<16x128xf32>
    %110 = vector.shape_cast %107 : vector<16x128xf32> to vector<1x16x128xf32>
    tpu.vector_store %arg9[%c0_36, %c0_37, %c0_38], %110 {strides = array<i32>} : memref<1x16x128xf32, #tpu.memory_space<vmem>>, vector<1x16x128xf32>,
    return
  }
  func.func @transform_0(%arg0: i32, %arg1: i32) -> (i32, i32, i32) {
    %c0_i32 = arith.constant 0 : i32
    %c0_i32_0 = arith.constant 0 : i32
    %c0_i32_1 = arith.constant 0 : i32
    return %arg0, %c0_i32, %c0_i32_0 : i32, i32, i32
  }
  func.func @transform_1(%arg0: i32, %arg1: i32) -> (i32, i32) {
    %c0_i32 = arith.constant 0 : i32
    %c0_i32_0 = arith.constant 0 : i32
    %c0_i32_1 = arith.constant 0 : i32
    return %c0_i32, %c0_i32_0 : i32, i32
  }
  func.func @transform_2(%arg0: i32, %arg1: i32) -> (i32, i32) {
    %c0_i32 = arith.constant 0 : i32
    %c0_i32_0 = arith.constant 0 : i32
    %c0_i32_1 = arith.constant 0 : i32
    return %c0_i32, %c0_i32_0 : i32, i32
  }
  func.func @transform_3(%arg0: i32, %arg1: i32) -> (i32, i32) {
    %c0_i32 = arith.constant 0 : i32
    %c0_i32_0 = arith.constant 0 : i32
    %c0_i32_1 = arith.constant 0 : i32
    return %c0_i32, %c0_i32_0 : i32, i32
  }
  func.func @transform_4(%arg0: i32, %arg1: i32) -> (i32, i32) {
    %c0_i32 = arith.constant 0 : i32
    %c0_i32_0 = arith.constant 0 : i32
    %c0_i32_1 = arith.constant 0 : i32
    return %c0_i32, %c0_i32_0 : i32, i32
  }
  func.func @transform_5(%arg0: i32, %arg1: i32) -> (i32, i32) {
    %c0_i32 = arith.constant 0 : i32
    %c0_i32_0 = arith.constant 0 : i32
    %c0_i32_1 = arith.constant 0 : i32
    return %c0_i32, %c0_i32_0 : i32, i32
  }
  func.func @transform_6(%arg0: i32, %arg1: i32) -> (i32, i32) {
    %c0_i32 = arith.constant 0 : i32
    %c0_i32_0 = arith.constant 0 : i32
    %c0_i32_1 = arith.constant 0 : i32
    return %c0_i32, %c0_i32_0 : i32, i32
  }
  func.func @transform_7(%arg0: i32, %arg1: i32) -> (i32, i32, i32) {
    %c0_i32 = arith.constant 0 : i32
    %c0_i32_0 = arith.constant 0 : i32
    return %arg0, %arg1, %c0_i32 : i32, i32, i32
  }
}

module attributes {stable_mosaic.version = 11 : i64} {
  func.func @_mlp_kernel(%arg0: i32, %arg1: i32, %arg2: memref<1x64x128xbf16, #tpu.memory_space<vmem>>, %arg3: memref<128x128xbf16, #tpu.memory_space<vmem>>, %arg4: memref<1x128xf32, #tpu.memory_space<vmem>>, %arg5: memref<9x128xf32, #tpu.memory_space<vmem>>, %arg6: memref<1x128xf32, #tpu.memory_space<vmem>>, %arg7: memref<128x128xbf16, #tpu.memory_space<vmem>>, %arg8: memref<1x128xf32, #tpu.memory_space<vmem>>, %arg9: memref<1x16x128xf32, #tpu.memory_space<vmem>>, %arg10: memref<4x10x128xf32, #tpu.memory_space<vmem>>) attributes {dimension_semantics = [#tpu.dimension_semantics<parallel>, #tpu.dimension_semantics<parallel>], iteration_bounds = array<i64: 2, 4>, scalar_prefetch = 0 : i64, scratch_operands = 1 : i64, tpu.core_type = #tpu.core_type<tc>, window_params = [{transform_indices = @transform_0, window_bounds = array<i64: 1, 64, 128>}, {pipeline_mode = #tpu.pipeline_mode<synchronous>, transform_indices = @transform_1, window_bounds = array<i64: 128, 128>}, {pipeline_mode = #tpu.pipeline_mode<synchronous>, transform_indices = @transform_2, window_bounds = array<i64: 1, 128>}, {pipeline_mode = #tpu.pipeline_mode<synchronous>, transform_indices = @transform_3, window_bounds = array<i64: 9, 128>}, {pipeline_mode = #tpu.pipeline_mode<synchronous>, transform_indices = @transform_4, window_bounds = array<i64: 1, 128>}, {pipeline_mode = #tpu.pipeline_mode<synchronous>, transform_indices = @transform_5, window_bounds = array<i64: 128, 128>}, {pipeline_mode = #tpu.pipeline_mode<synchronous>, transform_indices = @transform_6, window_bounds = array<i64: 1, 128>}, {transform_indices = @transform_7, window_bounds = array<i64: 1, 16, 128>}]} {
    %c0 = arith.constant 0 : index
    %c0_0 = arith.constant 0 : index
    %0 = vector.load %arg3[%c0, %c0_0] : memref<128x128xbf16, #tpu.memory_space<vmem>>, vector<128x128xbf16>
    %c0_1 = arith.constant 0 : index
    %c0_2 = arith.constant 0 : index
    %1 = vector.load %arg4[%c0_1, %c0_2] : memref<1x128xf32, #tpu.memory_space<vmem>>, vector<1x128xf32>
    %c16_i32 = arith.constant 16 : i32
    %2 = arith.muli %arg1, %c16_i32 : i32
    %3 = tpu.assume_multiple %2, 16 : i32
    %c0_3 = arith.constant 0 : index
    %4 = arith.index_cast %3 : i32 to index
    %c0_4 = arith.constant 0 : index
    %5 = vector.load %arg2[%c0_3, %4, %c0_4] : memref<1x64x128xbf16, #tpu.memory_space<vmem>>, vector<1x16x128xbf16>
    %6 = vector.shape_cast %5 : vector<1x16x128xbf16> to vector<16x128xbf16>
    %cst = arith.constant dense<0.000000e+00> : vector<16x128xf32>
    %7 = tpu.matmul %6, %0, %cst {dimension_numbers = #tpu.dot_dimension_numbers<[1], [0], [0], [1], [0, 0, 1, 1], [], []>} : vector<16x128xbf16>, vector<128x128xbf16>, vector<16x128xf32> -> vector<16x128xf32>
    %8 = vector.broadcast %1 : vector<1x128xf32> to vector<16x128xf32>
    %9 = arith.addf %7, %8 : vector<16x128xf32>
    %cst_5 = arith.constant 0.000000e+00 : f32
    %10 = vector.broadcast %cst_5 : f32 to vector<1x10x128xf32>
    %c0_6 = arith.constant 0 : index
    %c0_7 = arith.constant 0 : index
    %c0_8 = arith.constant 0 : index
    %11 = vector.load %arg10[%c0_6, %c0_7, %c0_8] : memref<4x10x128xf32, #tpu.memory_space<vmem>>, vector<1x10x128xf32>
    tpu.vector_store %arg10[%c0_6, %c0_7, %c0_8], %10 {strides = array<i32>} : memref<4x10x128xf32, #tpu.memory_space<vmem>>, vector<1x10x128xf32>,
    %c3 = arith.constant 3 : index
    %c0_9 = arith.constant 0 : index
    %c0_10 = arith.constant 0 : index
    %12 = vector.load %arg10[%c3, %c0_9, %c0_10] : memref<4x10x128xf32, #tpu.memory_space<vmem>>, vector<1x10x128xf32>
    tpu.vector_store %arg10[%c3, %c0_9, %c0_10], %10 {strides = array<i32>} : memref<4x10x128xf32, #tpu.memory_space<vmem>>, vector<1x10x128xf32>,
    %cst_11 = arith.constant 0.000000e+00 : f32
    %13 = vector.broadcast %cst_11 : f32 to vector<2x1x128xf32>
    %c1 = arith.constant 1 : index
    %c0_12 = arith.constant 0 : index
    %c0_13 = arith.constant 0 : index
    %14 = vector.load %arg10[%c1, %c0_12, %c0_13] : memref<4x10x128xf32, #tpu.memory_space<vmem>>, vector<2x1x128xf32>
    tpu.vector_store %arg10[%c1, %c0_12, %c0_13], %13 {strides = array<i32>} : memref<4x10x128xf32, #tpu.memory_space<vmem>>, vector<2x1x128xf32>,
    %c1_14 = arith.constant 1 : index
    %c9 = arith.constant 9 : index
    %c0_15 = arith.constant 0 : index
    %15 = vector.load %arg10[%c1_14, %c9, %c0_15] : memref<4x10x128xf32, #tpu.memory_space<vmem>>, vector<2x1x128xf32>
    tpu.vector_store %arg10[%c1_14, %c9, %c0_15], %13 {strides = array<i32>} : memref<4x10x128xf32, #tpu.memory_space<vmem>>, vector<2x1x128xf32>,
    %16 = vector.shape_cast %9 : vector<16x128xf32> to vector<2x8x128xf32>
    %c1_16 = arith.constant 1 : index
    %c1_17 = arith.constant 1 : index
    %c0_18 = arith.constant 0 : index
    %17 = vector.load %arg10[%c1_16, %c1_17, %c0_18] : memref<4x10x128xf32, #tpu.memory_space<vmem>>, vector<2x8x128xf32>
    tpu.vector_store %arg10[%c1_16, %c1_17, %c0_18], %16 {strides = array<i32>} : memref<4x10x128xf32, #tpu.memory_space<vmem>>, vector<2x8x128xf32>,
    %c0_i32 = arith.constant 0 : i32
    %18 = arith.cmpi sgt, %arg1, %c0_i32 : i32
    %19 = arith.extui %18 : i1 to i32
    %c0_i32_19 = arith.constant 0 : i32
    %20 = arith.cmpi ne, %19, %c0_i32_19 : i32
    scf.if %20 {
      %c2_i32 = arith.constant 2 : i32
      %111 = arith.muli %arg1, %c2_i32 : i32
      %c1_i32 = arith.constant 1 : i32
      %112 = arith.subi %111, %c1_i32 : i32
      %c8_i32 = arith.constant 8 : i32
      %113 = arith.muli %112, %c8_i32 : i32
      %114 = tpu.assume_multiple %113, 8 : i32
      %c0_39 = arith.constant 0 : index
      %115 = arith.index_cast %114 : i32 to index
      %c0_40 = arith.constant 0 : index
      %116 = vector.load %arg2[%c0_39, %115, %c0_40] : memref<1x64x128xbf16, #tpu.memory_space<vmem>>, vector<1x8x128xbf16>
      %117 = vector.shape_cast %116 : vector<1x8x128xbf16> to vector<8x128xbf16>
      %cst_41 = arith.constant dense<0.000000e+00> : vector<8x128xf32>
      %118 = tpu.matmul %117, %0, %cst_41 {dimension_numbers = #tpu.dot_dimension_numbers<[1], [0], [0], [1], [0, 0, 1, 1], [], []>} : vector<8x128xbf16>, vector<128x128xbf16>, vector<8x128xf32> -> vector<8x128xf32>
      %119 = vector.broadcast %1 : vector<1x128xf32> to vector<8x128xf32>
      %120 = arith.addf %118, %119 : vector<8x128xf32>
      %121 = vector.shape_cast %120 : vector<8x128xf32> to vector<1x8x128xf32>
      %c0_42 = arith.constant 0 : index
      %c1_43 = arith.constant 1 : index
      %c0_44 = arith.constant 0 : index
      %122 = vector.load %arg10[%c0_42, %c1_43, %c0_44] : memref<4x10x128xf32, #tpu.memory_space<vmem>>, vector<1x8x128xf32>
      tpu.vector_store %arg10[%c0_42, %c1_43, %c0_44], %121 {strides = array<i32>} : memref<4x10x128xf32, #tpu.memory_space<vmem>>, vector<1x8x128xf32>,
    } else {
    }
    %c3_i32 = arith.constant 3 : i32
    %21 = arith.cmpi slt, %arg1, %c3_i32 : i32
    %22 = arith.extui %21 : i1 to i32
    %c0_i32_20 = arith.constant 0 : i32
    %23 = arith.cmpi ne, %22, %c0_i32_20 : i32
    scf.if %23 {
      %c1_i32 = arith.constant 1 : i32
      %111 = arith.addi %arg1, %c1_i32 : i32
      %c16_i32_39 = arith.constant 16 : i32
      %112 = arith.muli %111, %c16_i32_39 : i32
      %113 = tpu.assume_multiple %112, 8 : i32
      %c0_40 = arith.constant 0 : index
      %114 = arith.index_cast %113 : i32 to index
      %c0_41 = arith.constant 0 : index
      %115 = vector.load %arg2[%c0_40, %114, %c0_41] : memref<1x64x128xbf16, #tpu.memory_space<vmem>>, vector<1x8x128xbf16>
      %116 = vector.shape_cast %115 : vector<1x8x128xbf16> to vector<8x128xbf16>
      %cst_42 = arith.constant dense<0.000000e+00> : vector<8x128xf32>
      %117 = tpu.matmul %116, %0, %cst_42 {dimension_numbers = #tpu.dot_dimension_numbers<[1], [0], [0], [1], [0, 0, 1, 1], [], []>} : vector<8x128xbf16>, vector<128x128xbf16>, vector<8x128xf32> -> vector<8x128xf32>
      %118 = vector.broadcast %1 : vector<1x128xf32> to vector<8x128xf32>
      %119 = arith.addf %117, %118 : vector<8x128xf32>
      %120 = vector.shape_cast %119 : vector<8x128xf32> to vector<1x8x128xf32>
      %c3_43 = arith.constant 3 : index
      %c1_44 = arith.constant 1 : index
      %c0_45 = arith.constant 0 : index
      %121 = vector.load %arg10[%c3_43, %c1_44, %c0_45] : memref<4x10x128xf32, #tpu.memory_space<vmem>>, vector<1x8x128xf32>
      tpu.vector_store %arg10[%c3_43, %c1_44, %c0_45], %120 {strides = array<i32>} : memref<4x10x128xf32, #tpu.memory_space<vmem>>, vector<1x8x128xf32>,
    } else {
    }
    %c0_21 = arith.constant 0 : index
    %c0_22 = arith.constant 0 : index
    %c0_23 = arith.constant 0 : index
    %24 = vector.load %arg10[%c0_21, %c0_22, %c0_23] : memref<4x10x128xf32, #tpu.memory_space<vmem>>, vector<4x10x128xf32>
    %c0_24 = arith.constant 0 : index
    %c0_25 = arith.constant 0 : index
    %25 = vector.load %arg5[%c0_24, %c0_25] : memref<9x128xf32, #tpu.memory_space<vmem>>, vector<9x128xf32>
    %c0_26 = arith.constant 0 : index
    %c0_27 = arith.constant 0 : index
    %26 = vector.load %arg6[%c0_26, %c0_27] : memref<1x128xf32, #tpu.memory_space<vmem>>, vector<1x128xf32>
    %27 = vector.shape_cast %26 : vector<1x128xf32> to vector<1x1x128xf32>
    %28 = vector.shape_cast %27 : vector<1x1x128xf32> to vector<1x1x128xf32>
    %29 = vector.broadcast %28 : vector<1x1x128xf32> to vector<2x8x128xf32>
    %30 = vector.extract_strided_slice %24 {offsets = [0, 0, 0], sizes = [2, 8, 128], strides = [1, 1, 1]} : vector<4x10x128xf32> to vector<2x8x128xf32>
    %31 = vector.extract_strided_slice %25 {offsets = [0, 0], sizes = [1, 128], strides = [1, 1]} : vector<9x128xf32> to vector<1x128xf32>
    %32 = vector.shape_cast %31 : vector<1x128xf32> to vector<128xf32>
    %33 = vector.shape_cast %32 : vector<128xf32> to vector<1x1x128xf32>
    %34 = vector.broadcast %33 : vector<1x1x128xf32> to vector<2x8x128xf32>
    %35 = arith.mulf %30, %34 : vector<2x8x128xf32>
    %36 = arith.addf %29, %35 : vector<2x8x128xf32>
    %37 = vector.extract_strided_slice %24 {offsets = [0, 1, 0], sizes = [2, 8, 128], strides = [1, 1, 1]} : vector<4x10x128xf32> to vector<2x8x128xf32>
    %38 = vector.extract_strided_slice %25 {offsets = [1, 0], sizes = [1, 128], strides = [1, 1]} : vector<9x128xf32> to vector<1x128xf32>
    %39 = vector.shape_cast %38 : vector<1x128xf32> to vector<128xf32>
    %40 = vector.shape_cast %39 : vector<128xf32> to vector<1x1x128xf32>
    %41 = vector.broadcast %40 : vector<1x1x128xf32> to vector<2x8x128xf32>
    %42 = arith.mulf %37, %41 : vector<2x8x128xf32>
    %43 = arith.addf %36, %42 : vector<2x8x128xf32>
    %44 = vector.extract_strided_slice %24 {offsets = [0, 2, 0], sizes = [2, 8, 128], strides = [1, 1, 1]} : vector<4x10x128xf32> to vector<2x8x128xf32>
    %45 = vector.extract_strided_slice %25 {offsets = [2, 0], sizes = [1, 128], strides = [1, 1]} : vector<9x128xf32> to vector<1x128xf32>
    %46 = vector.shape_cast %45 : vector<1x128xf32> to vector<128xf32>
    %47 = vector.shape_cast %46 : vector<128xf32> to vector<1x1x128xf32>
    %48 = vector.broadcast %47 : vector<1x1x128xf32> to vector<2x8x128xf32>
    %49 = arith.mulf %44, %48 : vector<2x8x128xf32>
    %50 = arith.addf %43, %49 : vector<2x8x128xf32>
    %51 = vector.extract_strided_slice %24 {offsets = [1, 0, 0], sizes = [2, 8, 128], strides = [1, 1, 1]} : vector<4x10x128xf32> to vector<2x8x128xf32>
    %52 = vector.extract_strided_slice %25 {offsets = [3, 0], sizes = [1, 128], strides = [1, 1]} : vector<9x128xf32> to vector<1x128xf32>
    %53 = vector.shape_cast %52 : vector<1x128xf32> to vector<128xf32>
    %54 = vector.shape_cast %53 : vector<128xf32> to vector<1x1x128xf32>
    %55 = vector.broadcast %54 : vector<1x1x128xf32> to vector<2x8x128xf32>
    %56 = arith.mulf %51, %55 : vector<2x8x128xf32>
    %57 = arith.addf %50, %56 : vector<2x8x128xf32>
    %58 = vector.extract_strided_slice %24 {offsets = [1, 1, 0], sizes = [2, 8, 128], strides = [1, 1, 1]} : vector<4x10x128xf32> to vector<2x8x128xf32>
    %59 = vector.extract_strided_slice %25 {offsets = [4, 0], sizes = [1, 128], strides = [1, 1]} : vector<9x128xf32> to vector<1x128xf32>
    %60 = vector.shape_cast %59 : vector<1x128xf32> to vector<128xf32>
    %61 = vector.shape_cast %60 : vector<128xf32> to vector<1x1x128xf32>
    %62 = vector.broadcast %61 : vector<1x1x128xf32> to vector<2x8x128xf32>
    %63 = arith.mulf %58, %62 : vector<2x8x128xf32>
    %64 = arith.addf %57, %63 : vector<2x8x128xf32>
    %65 = vector.extract_strided_slice %24 {offsets = [1, 2, 0], sizes = [2, 8, 128], strides = [1, 1, 1]} : vector<4x10x128xf32> to vector<2x8x128xf32>
    %66 = vector.extract_strided_slice %25 {offsets = [5, 0], sizes = [1, 128], strides = [1, 1]} : vector<9x128xf32> to vector<1x128xf32>
    %67 = vector.shape_cast %66 : vector<1x128xf32> to vector<128xf32>
    %68 = vector.shape_cast %67 : vector<128xf32> to vector<1x1x128xf32>
    %69 = vector.broadcast %68 : vector<1x1x128xf32> to vector<2x8x128xf32>
    %70 = arith.mulf %65, %69 : vector<2x8x128xf32>
    %71 = arith.addf %64, %70 : vector<2x8x128xf32>
    %72 = vector.extract_strided_slice %24 {offsets = [2, 0, 0], sizes = [2, 8, 128], strides = [1, 1, 1]} : vector<4x10x128xf32> to vector<2x8x128xf32>
    %73 = vector.extract_strided_slice %25 {offsets = [6, 0], sizes = [1, 128], strides = [1, 1]} : vector<9x128xf32> to vector<1x128xf32>
    %74 = vector.shape_cast %73 : vector<1x128xf32> to vector<128xf32>
    %75 = vector.shape_cast %74 : vector<128xf32> to vector<1x1x128xf32>
    %76 = vector.broadcast %75 : vector<1x1x128xf32> to vector<2x8x128xf32>
    %77 = arith.mulf %72, %76 : vector<2x8x128xf32>
    %78 = arith.addf %71, %77 : vector<2x8x128xf32>
    %79 = vector.extract_strided_slice %24 {offsets = [2, 1, 0], sizes = [2, 8, 128], strides = [1, 1, 1]} : vector<4x10x128xf32> to vector<2x8x128xf32>
    %80 = vector.extract_strided_slice %25 {offsets = [7, 0], sizes = [1, 128], strides = [1, 1]} : vector<9x128xf32> to vector<1x128xf32>
    %81 = vector.shape_cast %80 : vector<1x128xf32> to vector<128xf32>
    %82 = vector.shape_cast %81 : vector<128xf32> to vector<1x1x128xf32>
    %83 = vector.broadcast %82 : vector<1x1x128xf32> to vector<2x8x128xf32>
    %84 = arith.mulf %79, %83 : vector<2x8x128xf32>
    %85 = arith.addf %78, %84 : vector<2x8x128xf32>
    %86 = vector.extract_strided_slice %24 {offsets = [2, 2, 0], sizes = [2, 8, 128], strides = [1, 1, 1]} : vector<4x10x128xf32> to vector<2x8x128xf32>
    %87 = vector.extract_strided_slice %25 {offsets = [8, 0], sizes = [1, 128], strides = [1, 1]} : vector<9x128xf32> to vector<1x128xf32>
    %88 = vector.shape_cast %87 : vector<1x128xf32> to vector<128xf32>
    %89 = vector.shape_cast %88 : vector<128xf32> to vector<1x1x128xf32>
    %90 = vector.broadcast %89 : vector<1x1x128xf32> to vector<2x8x128xf32>
    %91 = arith.mulf %86, %90 : vector<2x8x128xf32>
    %92 = arith.addf %85, %91 : vector<2x8x128xf32>
    %cst_28 = arith.constant 5.000000e-01 : f32
    %93 = vector.broadcast %cst_28 : f32 to vector<2x8x128xf32>
    %94 = arith.mulf %93, %92 : vector<2x8x128xf32>
    %cst_29 = arith.constant 0.707106769 : f32
    %95 = vector.broadcast %cst_29 : f32 to vector<2x8x128xf32>
    %96 = arith.mulf %92, %95 : vector<2x8x128xf32>
    %97 = math.erf %96 : vector<2x8x128xf32>
    %cst_30 = arith.constant 1.000000e+00 : f32
    %98 = vector.broadcast %cst_30 : f32 to vector<2x8x128xf32>
    %99 = arith.addf %98, %97 : vector<2x8x128xf32>
    %100 = arith.mulf %94, %99 : vector<2x8x128xf32>
    %101 = vector.shape_cast %100 : vector<2x8x128xf32> to vector<16x128xf32>
    %102 = arith.truncf %101 : vector<16x128xf32> to vector<16x128xbf16>
    %c0_31 = arith.constant 0 : index
    %c0_32 = arith.constant 0 : index
    %103 = vector.load %arg7[%c0_31, %c0_32] : memref<128x128xbf16, #tpu.memory_space<vmem>>, vector<128x128xbf16>
    %cst_33 = arith.constant dense<0.000000e+00> : vector<16x128xf32>
    %104 = tpu.matmul %102, %103, %cst_33 {dimension_numbers = #tpu.dot_dimension_numbers<[1], [0], [0], [1], [0, 0, 1, 1], [], []>} : vector<16x128xbf16>, vector<128x128xbf16>, vector<16x128xf32> -> vector<16x128xf32>
    %c0_34 = arith.constant 0 : index
    %c0_35 = arith.constant 0 : index
    %105 = vector.load %arg8[%c0_34, %c0_35] : memref<1x128xf32, #tpu.memory_space<vmem>>, vector<1x128xf32>
    %106 = vector.broadcast %105 : vector<1x128xf32> to vector<16x128xf32>
    %107 = arith.addf %104, %106 : vector<16x128xf32>
    %c0_36 = arith.constant 0 : index
    %c0_37 = arith.constant 0 : index
    %c0_38 = arith.constant 0 : index
    %108 = vector.load %arg9[%c0_36, %c0_37, %c0_38] : memref<1x16x128xf32, #tpu.memory_space<vmem>>, vector<1x16x128xf32>
    %109 = vector.shape_cast %108 : vector<1x16x128xf32> to vector<16x128xf32>
    %110 = vector.shape_cast %107 : vector<16x128xf32> to vector<1x16x128xf32>
    tpu.vector_store %arg9[%c0_36, %c0_37, %c0_38], %110 {strides = array<i32>} : memref<1x16x128xf32, #tpu.memory_space<vmem>>, vector<1x16x128xf32>,
    return
  }
  func.func @transform_0(%arg0: i32, %arg1: i32) -> (i32, i32, i32) {
    %c0_i32 = arith.constant 0 : i32
    %c0_i32_0 = arith.constant 0 : i32
    %c0_i32_1 = arith.constant 0 : i32
    return %arg0, %c0_i32, %c0_i32_0 : i32, i32, i32
  }
  func.func @transform_1(%arg0: i32, %arg1: i32) -> (i32, i32) {
    %c0_i32 = arith.constant 0 : i32
    %c0_i32_0 = arith.constant 0 : i32
    %c0_i32_1 = arith.constant 0 : i32
    return %c0_i32, %c0_i32_0 : i32, i32
  }
  func.func @transform_2(%arg0: i32, %arg1: i32) -> (i32, i32) {
    %c0_i32 = arith.constant 0 : i32
    %c0_i32_0 = arith.constant 0 : i32
    %c0_i32_1 = arith.constant 0 : i32
    return %c0_i32, %c0_i32_0 : i32, i32
  }
  func.func @transform_3(%arg0: i32, %arg1: i32) -> (i32, i32) {
    %c0_i32 = arith.constant 0 : i32
    %c0_i32_0 = arith.constant 0 : i32
    %c0_i32_1 = arith.constant 0 : i32
    return %c0_i32, %c0_i32_0 : i32, i32
  }
  func.func @transform_4(%arg0: i32, %arg1: i32) -> (i32, i32) {
    %c0_i32 = arith.constant 0 : i32
    %c0_i32_0 = arith.constant 0 : i32
    %c0_i32_1 = arith.constant 0 : i32
    return %c0_i32, %c0_i32_0 : i32, i32
  }
  func.func @transform_5(%arg0: i32, %arg1: i32) -> (i32, i32) {
    %c0_i32 = arith.constant 0 : i32
    %c0_i32_0 = arith.constant 0 : i32
    %c0_i32_1 = arith.constant 0 : i32
    return %c0_i32, %c0_i32_0 : i32, i32
  }
  func.func @transform_6(%arg0: i32, %arg1: i32) -> (i32, i32) {
    %c0_i32 = arith.constant 0 : i32
    %c0_i32_0 = arith.constant 0 : i32
    %c0_i32_1 = arith.constant 0 : i32
    return %c0_i32, %c0_i32_0 : i32, i32
  }
  func.func @transform_7(%arg0: i32, %arg1: i32) -> (i32, i32, i32) {
    %c0_i32 = arith.constant 0 : i32
    %c0_i32_0 = arith.constant 0 : i32
    return %arg0, %arg1, %c0_i32 : i32, i32, i32
  }
}

</mosaic_0001>

<bundles_post_ra>
// kernel: tpu_custom_call.1
= control target key start
LH: loop header
LB: loop body
LE: loop exit
PB: predicated region body
PF: predicated region fallthrough
CT: control target
= control target key end

     0   :  { %s2144_s0 = inlined_call_operand.hbm [shape: bf16[2,64,128], index: 0, kind: input, shape index: {}]   ;;  %s2145_s1 = inlined_call_operand.hbm [shape: bf16[128,128], index: 1, kind: input, shape index: {}]   ;;  %s2146_s2 = inlined_call_operand.vmem [shape: f32[1,128], index: 2, kind: input, shape index: {}]   ;;  %s2147_s3 = inlined_call_operand.hbm [shape: f32[9,128], index: 3, kind: input, shape index: {}]   ;;  %s2148_s4 = inlined_call_operand.vmem [shape: f32[1,128], index: 4, kind: input, shape index: {}]   ;;  %s2149_s5 = inlined_call_operand.hbm [shape: bf16[128,128], index: 5, kind: input, shape index: {}]   ;;  %s2150_s6 = inlined_call_operand.vmem [shape: f32[1,128], index: 6, kind: input, shape index: {}]   ;;  %s2151_s7 = inlined_call_operand.hbm [shape: f32[2,64,128], index: 7, kind: output, shape index: {}]  }
   0x1   :  { %2168 = sst [smem:[#allocation22_spill]] %s2145_s1 }
   0x2   :  { %2169 = sst [smem:[#allocation23_spill]] %s2147_s3 }
   0x3   :  { %2170 = sst [smem:[#allocation24_spill]] %s2148_s4 }
   0x4   :  { %2171 = sst [smem:[#allocation25_spill]] %s2149_s5 }
   0x5   :  { %2172 = sst [smem:[#allocation26_spill]] %s2150_s6 }
   0x6   :  { %2173 = sst [smem:[#allocation27_spill]] %s2151_s7 }
   0x7   :  { %12 = vsyncpa [#allocation4], 0 }
   0x8   :  { %14 = vsyncpa [#allocation4 + $0x1], 0 }
   0x9   :  { %15 = vsyncpa [#allocation7], 0 }
   0xa   :  { %16 = vsyncpa [#allocation10], 0 }
   0xb   :  { %17 = vsyncpa [#allocation5], 0 }
   0xc   :  { %19 = vsyncpa [#allocation5 + $0x1], 0  ;;  %s1678_s24 = smov 0   ;;  %s1680_s25 = smov 0  }
   0xd   :  { %s1682_s26 = smov 0   ;;  %s1684_s27 = smov 0  }
   0xe   :  { %s1686_s28 = smov 0   ;;  %s1688_s29 = smov 0  }
   0xf   :  { %s1690_s30 = smov 0   ;;  %s1692_s8 = smov 0  }
  0x10   :  { %s1694_s9 = smov 0   ;;  %s1696_s10 = smov 0  }
  0x11   :  { %s1698_s11 = smov 0  }
  0x12 LB: > { %2174 = sst [smem:[#allocation16_spill]] %s1579_s24  ;;  %s1037_s12 = sadd.s32 4294967295, %s1619_s11   ;;  %s1619_s11 = sphi %s1698_s11, %s25_s11   ;;  %s1615_s10 = sphi %s1696_s10, %s2218_s10   ;;  %s1611_s9 = sphi %s1694_s9, %s2217_s9   ;;  %s1607_s8 = sphi %s1692_s8, %s2216_s8   ;;  %s1603_s30 = sphi %s1690_s30, %s2215_s30   ;;  %s1599_s29 = sphi %s1688_s29, %s2214_s29   ;;  %s1595_s28 = sphi %s1686_s28, %s2213_s28   ;;  %s1591_s27 = sphi %s1684_s27, %s2212_s27   ;;  %s1587_s26 = sphi %s1682_s26, %s2211_s26   ;;  %s1583_s25 = sphi %s1680_s25, %s2210_s25   ;;  %s1579_s24 = sphi %s1678_s24, %s2209_s24  }
  0x13   : > { %2175 = sst [smem:[#allocation17_spill]] %s1607_s8  ;;  %s1038_s13 = sadd.s32 4294967294, %s1619_s11  }
  0x14   : > { %p57_p0 = scmp.ne.s32.totalorder %s1595_s28, %s1591_s27  ;;  %p1734_p1 = scmp.eq.s32.totalorder %s1037_s12, 0 }
  0x15   : > { %p208_p2 = scmp.ne.s32.totalorder %s1587_s26, %s1583_s25  ;;  %p209_p4 = scmp.eq.s32.totalorder %s1037_s12, 7 }
  0x16   : > { %s2176_s14 = scalar_select %p1734_p1, 1, 0 }
  0x17   : > { %p1743_p3 = por %p1734_p1, %p57_p0  ;;  %p214_p5 = scmp.ne.s32.totalorder %s1583_s25, %s1579_s24 }
  0x18   : > { %p215_p6 = scmp.eq.s32.totalorder %s1038_s13, 7  ;;  %p1749_p7 = por %p209_p4, %p208_p2 }
  0x19   : > { %s2177_s16 = scalar_select %p1743_p3, 1, 0 }
  0x1a   : > { %s2178_s17 = scalar_select %p1749_p7, 1, 0 }
  0x1b   : > { %p1039_p8 = scmp.ge.s32.totalorder %s1619_s11, 1  ;;  %p1754_p9 = por %p215_p6, %p214_p5 }
  0x1c   : > { %2179 = sst [smem:[#allocation18_spill]] %s2178_s17  ;;  %p222_p10 = scmp.lt.s32.totalorder %s1619_s11, 9 }
  0x1d   : > { %s2180_s18 = scalar_select %p1754_p9, 1, 0 }
  0x1e   : > { %p1759_p11 = pnand %p1039_p8, %p222_p10  ;;  %s1621_s20 = smov [#allocation6]  }
  0x1f   : > { %2181 = sst [smem:[#allocation19_spill]] %s2180_s18  ;;  %s234_s21 = sshll.u32 %s1621_s20, 4  ;;  %s235_s21 = int_to_ptr.vmem [resolvable:$true] %s234_s21 }
  0x20   : > { %s2182_s19 = scalar_select %p1759_p11, 1, 0 }
  0x21   : > { %p1225_p12 = pneg %p1759_p11  ;;  %s1622_s23 = smov [#allocation8]  }
  0x22   : > { %s250_s27 = sshll.u32 %s1622_s23, 4  ;;  %s2184_s1 = sld [smem:[#allocation22_spill]]  ;;  %s1771_s27 = int_to_ptr.vmem [resolvable:$true] %s250_s27 }
  0x23   : > { %p1767_p13 = pnand %p1225_p12, %p1734_p1 }
  0x25   : > { %p1781_p2 = pneg %p1767_p13 }
  0x28   : > { %s1375_s15 = scalar_lea.hbm %s2184_s1, 1024 }
  0x29   : > { %p1376_p0 = scmp.ne.s32.totalorder %s2184_s1, %s1375_s15  ;;  %p1382_p6 = scmp.lt.u32.totalorder %s1375_s15, %s2184_s1 }
  0x2b   : > { %p1378_p4 = pnand %p1781_p2, %p1376_p0 }
  0x2d   : > { %p1379_p5 = pneg %p1378_p4 }
  0x2f   : > { %p1384_p8 = pnand %p1382_p6, %p1379_p5 }
  0x31   : > { %1387 = shalt.err (!%p1384_p8)
}
  0x32   : > { %s1388_s12 = scalar_lea.vmem %s235_s21, 1024  ;;  %p1396_p7 = scmp.lt.s32.totalorder %s235_s21, %s235_s21 }
  0x33   : > { %p1389_p10 = scmp.ne.s32.totalorder %s235_s21, %s1388_s12  ;;  %p1397_p1 = scmp.lt.s32.totalorder %s1388_s12, %s1388_s12 }
  0x35   : > { %p1391_p12 = pnand %p1389_p10, %p1781_p2  ;;  %p1398_p3 = por %p1397_p1, %p1396_p7 }
  0x37   : > { %p1392_p9 = pneg %p1391_p12 }
  0x39   : > { %p1399_p11 = pnand %p1398_p3, %p1392_p9 }
  0x3b   : > { %1402 = shalt.err (!%p1399_p11)
}
  0x3c   : > { %s2162_s24 = smov 64   ;;  %s2164_s18 = smov 4  }
  0x3d   : > { %1228 = dma.hbm_to_vmem [thread:$0]  (!%p1767_p13), %s2184_s1, 1024, %s235_s21, [#allocation7], %s2162_s24, %s2162_s24, %s2164_s18  }
  0x3e   : > { %s2186_s3 = sld [smem:[#allocation23_spill]] }
  0x44   : > { %s1403_s17 = scalar_lea.hbm %s2186_s3, 256 }
  0x45   : > { %p1404_p1 = scmp.ne.s32.totalorder %s2186_s3, %s1403_s17  ;;  %p1410_p9 = scmp.lt.u32.totalorder %s1403_s17, %s2186_s3 }
  0x47   : > { %p1406_p3 = pnand %p1404_p1, %p1781_p2 }
  0x49   : > { %p1407_p7 = pneg %p1406_p3 }
  0x4b   : > { %p1412_p11 = pnand %p1410_p9, %p1407_p7 }
  0x4d   : > { %1415 = shalt.err (!%p1412_p11)
}
  0x4e   : > { %s1416_s21 = scalar_lea.vmem %s1771_s27, 256  ;;  %p1424_p6 = scmp.lt.s32.totalorder %s1771_s27, %s1771_s27 }
  0x4f   : > { %p1417_p0 = scmp.ne.s32.totalorder %s1771_s27, %s1416_s21  ;;  %p1425_p8 = scmp.lt.s32.totalorder %s1416_s21, %s1416_s21 }
  0x51   : > { %p1419_p4 = pnand %p1417_p0, %p1781_p2  ;;  %p1426_p10 = por %p1425_p8, %p1424_p6 }
  0x53   : > { %p1420_p5 = pneg %p1419_p4 }
  0x55   : > { %p1427_p12 = pnand %p1426_p10, %p1420_p5 }
  0x57   : > { %1430 = shalt.err (!%p1427_p12)
}
  0x58   : > { %s1625_s6 = smov 128   ;;  %s1626_s4 = smov 8  }
  0x59   : > { %1231 = dma.hbm_to_vmem [thread:$0]  (!%p1767_p13), %s2186_s3, 256, %s1771_s27, [#allocation7], %s1625_s6, %s1625_s6, %s1626_s4  }
  0x5a   : > { %s1627_s7 = smov [#allocation9]   ;;  %s2187_s5 = sld [smem:[#allocation25_spill]] }
  0x5b   : > { %s266_s15 = sshll.u32 %s1627_s7, 4  ;;  %s267_s15 = int_to_ptr.vmem [resolvable:$true] %s266_s15 }
  0x60   : > { %s1431_s12 = scalar_lea.hbm %s2187_s5, 1024 }
  0x61   : > { %p1432_p1 = scmp.ne.s32.totalorder %s2187_s5, %s1431_s12  ;;  %p1438_p9 = scmp.lt.u32.totalorder %s1431_s12, %s2187_s5 }
  0x63   : > { %p1434_p3 = pnand %p1432_p1, %p1781_p2 }
  0x65   : > { %p1435_p7 = pneg %p1434_p3 }
  0x67   : > { %p1440_p11 = pnand %p1438_p9, %p1435_p7 }
  0x69   : > { %1443 = shalt.err (!%p1440_p11)
}
  0x6a   : > { %s1444_s27 = scalar_lea.vmem %s267_s15, 1024  ;;  %p1452_p6 = scmp.lt.s32.totalorder %s267_s15, %s267_s15 }
  0x6b   : > { %p1445_p0 = scmp.ne.s32.totalorder %s267_s15, %s1444_s27  ;;  %p1453_p8 = scmp.lt.s32.totalorder %s1444_s27, %s1444_s27 }
  0x6d   : > { %p1447_p4 = pnand %p1445_p0, %p1781_p2  ;;  %p1454_p10 = por %p1453_p8, %p1452_p6 }
  0x6f   : > { %p1448_p5 = pneg %p1447_p4 }
  0x71   : > { %p1455_p12 = pnand %p1454_p10, %p1448_p5 }
  0x73   : > { %1458 = shalt.err (!%p1455_p12)
}
  0x74   : > { %s2188_s24 = smov 4   ;;  %s2189_s6 = smov 64  }
  0x75   : > { %1234 = dma.hbm_to_vmem [thread:$0]  (!%p1767_p13), %s2187_s5, 1024, %s267_s15, [#allocation10], %s2189_s6, %s2189_s6, %s2188_s24  }
  0x76   : > { %s34_s20 = sadd.s32 1, %s1611_s9  ;;  %s37_s22 = sadd.s32 1, %s1615_s10 }
  0x77   : > { %p35_p2 = scmp.ge.s32.totalorder %s34_s20, 4  ;;  %s44_s4 = sadd.s32 1, %s1599_s29 }
  0x78   : > { %p51_p1 = scmp.ne.s32.totalorder %s1599_s29, %s1595_s28  ;;  %p52_p3 = scmp.eq.s32.totalorder %s1619_s11, 0 }
  0x79   : > { %s2220_s20 = smov (%p35_p2, %s34_s20), 0  ;;  %s2222_s22 = smov (!%p35_p2, %s37_s22), %s1615_s10 }
  0x7a   : > { %2190 = sst [smem:[#allocation20_spill]] %s2220_s20  ;;  %s194_s8 = ssub.s32 %s1611_s9, %s2220_s20 }
  0x7b   : > { %p39_p7 = scmp.ge.s32.totalorder %s2222_s22, 2  ;;  %p1246_p9 = scmp.lt.s32.totalorder %s1619_s11, 8 }
  0x7c   : > { %p1856_p13 = por %p52_p3, %p51_p1  ;;  %s283_s7 = sand.u32 1, %s1599_s29  }
  0x7d   : > { %s2224_s22 = smov (%p39_p7, %s2222_s22), 0  ;;  %s1044_s15 = sshll.u32 %s283_s7, 5 }
  0x7e   : > { %2192 = sst [smem:[#allocation21_spill]] %s2224_s22  ;;  %s41_s13 = ssub.s32 %s1615_s10, %s2224_s22 }
  0x7f   : > { %p42_p11 = scmp.eq.s32.totalorder %s41_s13, 0  ;;  %s195_s23 = sor.u32 %s194_s8, %s41_s13 }
  0x80   : > { %p196_p0 = scmp.eq.s32.totalorder %s195_s23, 0  ;;  %s1090_s12 = sshll.u32 %s1615_s10, 9 }
  0x81   : > { %s1867_s21 = scalar_select %p42_p11, %s1599_s29, %s44_s4  }
  0x82   : > { %s2193_s27 = sadd.s32 1, %s1587_s26  ;;  %s1877_s5 = scalar_lea.hbm %s2144_s0, %s1090_s12 }
  0x83   : > { %s1872_s1 = scalar_select %p196_p0, %s1587_s26, %s2193_s27  }
  0x84   : > { %s287_s20 = scalar_lea.vmem [#allocation3], %s1044_s15  ;;  %p1885_p4 = pnand %p1246_p9, %p1856_p13 }
  0x85   : > { %s294_s22 = sshll.u32 %s287_s20, 4  ;;  %s1889_s8 = scalar_lea.sflag [#allocation4], %s283_s7  ;;  %s1879_s22 = int_to_ptr.vmem [resolvable:$true] %s294_s22 }
  0x86   : > { %s1459_s3 = scalar_lea.hbm %s1877_s5, 512  ;;  %p1461_p6 = pneg %p1885_p4 }
  0x87   : > { %p1460_p5 = scmp.ne.s32.totalorder %s1877_s5, %s1459_s3  ;;  %s1464_s17 = scalar_lea.hbm %s2144_s0, 1024 }
  0x88   : > { %p1465_p12 = scmp.lt.u32.totalorder %s1877_s5, %s2144_s0  ;;  %p1466_p2 = scmp.lt.u32.totalorder %s1464_s17, %s1459_s3 }
  0x89   : > { %p1462_p8 = pnand %p1461_p6, %p1460_p5  ;;  %p1468_p3 = scmp.lt.u32.totalorder %s1459_s3, %s1877_s5 }
  0x8a   : > { %p1467_p1 = por %p1466_p2, %p1465_p12 }
  0x8b   : > { %p1463_p10 = pneg %p1462_p8 }
  0x8c   : > { %p1469_p7 = por %p1468_p3, %p1467_p1 }
  0x8e   : > { %p1470_p9 = pnand %p1469_p7, %p1463_p10 }
  0x90   : > { %1473 = shalt.err (!%p1470_p9)
}
  0x91   : > { %s1474_s7 = scalar_lea.vmem %s1879_s22, 512  ;;  %s1628_s12 = smov [#allocation3]  }
  0x92   : > { %p1475_p13 = scmp.ne.s32.totalorder %s1879_s22, %s1474_s7  ;;  %s1479_s27 = sshll.u32 %s1628_s12, 4  ;;  %s1480_s27 = int_to_ptr.vmem [resolvable:$false] %s1479_s27 }
  0x93   : > { %s1481_s18 = scalar_lea.vmem %s1480_s27, 1024  ;;  %p1482_p5 = scmp.lt.s32.totalorder %s1879_s22, %s1480_s27 }
  0x94   : > { %p1477_p11 = pnand %p1475_p13, %p1461_p6  ;;  %p1483_p8 = scmp.lt.s32.totalorder %s1481_s18, %s1474_s7 }
  0x96   : > { %p1478_p0 = pneg %p1477_p11  ;;  %p1484_p12 = por %p1483_p8, %p1482_p5 }
  0x98   : > { %p1485_p2 = pnand %p1484_p12, %p1478_p0 }
  0x9a   : > { %1488 = shalt.err (!%p1485_p2)
}
  0x9b   : > { %1238 = dma.hbm_to_vmem [thread:$0]  (!%p1885_p4), %s1877_s5, 512, %s1879_s22, %s1889_s8, %s2189_s6, %s2189_s6, %s2188_s24  }
  0x9c   : > { %p2195_p6 = scmp.ne.s32.totalorder %s2182_s19, 0 }
  0x9d   : > { %s308_s3 = sand.u32 (!%p2195_p6), 1, %s1595_s28   ;;  %p2196_p10 = scmp.ne.s32.totalorder (!%p2195_p6), %s2177_s16, 0 }
  0x9e   : > { %306 = sbr.rel (%p2195_p6) target bundleno = 1165 (0x48d), region = 48  ;;  %s1048_s20 = sshll.u32 (!%p2195_p6), %s308_s3, 5 }
  0x9f   : > { %s309_s15 = scalar_lea.sflag (!%p2195_p6), [#allocation4], %s308_s3  ;;  %s1923_s17 = scalar_lea.vmem (!%p2195_p6), [#allocation3], %s1048_s20 }
  0xa5   : > { %1562 = dma.done.wait (%p2196_p10), %s309_s15, 512  }
  0xa6   : > { %1564 = vsyncadd (%p2196_p10), %s309_s15, 4294966784  ;;  %p2197_p1 = scmp.ne.s32.totalorder %s2176_s14, 0 }
  0xa8   : > { %1566 = dma.done.wait (%p2197_p1), [#allocation7], 1280  }
  0xa9   : > { %1568 = vsyncadd (%p2197_p1), [#allocation7], 4294966016 }
  0xaa   : > { %1570 = dma.done.wait (%p2197_p1), [#allocation10], 1024  }
  0xab   : > { %1572 = vsyncadd (%p2197_p1), [#allocation10], 4294966272  ;;  %s352_s5 = sand.u32 1, %s1583_s25   ;;  %v1629_v0 = vmov 0.0   ;;  %vm1630_vm0 = vmmov 0   ;;  %s1053_s14 = sshll.u32 %s1603_s30, 4 }
  0xac   : > { %s1940_s16 = sshll.u32 %s352_s5, 4  ;;  %1129 = vmatprep.subr.bf16.mxu0 %v1629_v0  ;;  %482 = vst [vmem:[#allocation2] sm:$0xff] %v1629_v0  ;;  %483 = vst [vmem:[#allocation2 + $0x8] sm:$0x3] %v1629_v0  ;;  %1145 = vmatprep.mubr.msk.bf16.mxu0 %vm1630_vm0, %v1629_v0  ;;  %v1954_v1 = vld [vmem:[#allocation6] sm:$0xff]   ;;  %s375_s19 = sshra.s32 %s1053_s14, 3 }
  0xad   : > { %485 = vst [vmem:[#allocation2 + $0x30] sm:$0xff] %v1629_v0  ;;  %486 = vst [vmem:[#allocation2 + $0x38] sm:$0x3] %v1629_v0  ;;  %1130 = vmatpush3.bf16.msra.mxu0 %v1954_v1  ;;  %v1959_v2 = vld [vmem:[#allocation6 + $0x8] sm:$0xff]   ;;  %s1054_s24 = sshll.u32 %s375_s19, 2  ;;  %v1963_v3 = vld [vmem:[#allocation6 + $0x10] sm:$0xff]  }
  0xae   : > { %488 = vst [vmem:[#allocation2 + $0x10] sm:$0x1] %v1629_v0  ;;  %489 = vst [vmem:[#allocation2 + $0x20] sm:$0x1] %v1629_v0  ;;  %1131 = vmatprep.subr.bf16.mxu0 %v1629_v0  ;;  %s378_s6 = scalar_lea.vmem %s1923_s17, %s1054_s24 [#allocation3]  ;;  %v1968_v4 = vld [vmem:[#allocation6 + $0x18] sm:$0xff]   ;;  %v1972_v5 = vld [vmem:[#allocation6 + $0x20] sm:$0xff]  }
  0xaf   : > { %490 = vst [vmem:[#allocation2 + $0x19] sm:$0x1] %v1629_v0  ;;  %491 = vst [vmem:[#allocation2 + $0x29] sm:$0x1] %v1629_v0  ;;  %v1976_v6 = vld [vmem:[#allocation6 + $0x28] sm:$0xff]   ;;  %v1980_v7 = vld [vmem:[#allocation6 + $0x30] sm:$0xff]  }
  0xb0   : > { %v1984_v8 = vld [vmem:[#allocation6 + $0x38] sm:$0xff]   ;;  %v1362_v9 = vld [vmem:[%s378_s6] sm:$0xff]   ;;  %s1996_s8 = scalar_lea.vmem [#allocation11], %s1940_s16  ;;  %p1065_p4 = scmp.le.s32.totalorder %s1603_s30, 0 }
  0xb1   : > { %1132 = vmatpush3.bf16.msra.mxu0 %v1959_v2  ;;  %v1991_v10 = vld [vmem:[%s2146_s2] ss:$0 sm:$0xff]  ;;  %v1631_v17 = vmov (!%p1065_p4), 0.0   ;;  %vm1632_vm1 = vmmov (!%p1065_p4), 0   ;;  %s1066_s13 = sshll.u32 (!%p1065_p4), %s1603_s30, 1 }
  0xb2   : > { %1133 = vmatprep.subr.bf16.mxu0 %v1629_v0  ;;  %s1067_s23 = sadd.s32 (!%p1065_p4), 4294967295, %s1066_s13 }
  0xb3   : > { %s1068_s7 = sshll.u32 (!%p1065_p4), %s1067_s23, 3 }
  0xb4   : > { %s501_s12 = sshra.s32 (!%p1065_p4), %s1068_s7, 3 }
  0xb5   : > { %1134 = vmatpush3.bf16.msra.mxu0 %v1963_v3  ;;  %s1069_s27 = sshll.u32 (!%p1065_p4), %s501_s12, 2 }
  0xb6   : > { %1135 = vmatprep.subr.bf16.mxu0 %v1629_v0  ;;  %s504_s18 = scalar_lea.vmem (!%p1065_p4), %s1923_s17, %s1069_s27 [#allocation3] }
  0xb7   : > { %v505_v18 = vld [vmem:[%s504_s18] sm:$0xf] (!%p1065_p4) }
  0xb9   : > { %1136 = vmatpush3.bf16.msra.mxu0 %v1968_v4 }
  0xba   : > { %1137 = vmatprep.subr.bf16.mxu0 %v1629_v0 }
  0xbd   : > { %1138 = vmatpush3.bf16.msra.mxu0 %v1972_v5 }
  0xbe   : > { %1139 = vmatprep.subr.bf16.mxu0 %v1629_v0 }
  0xc1   : > { %1140 = vmatpush3.bf16.msra.mxu0 %v1976_v6 }
  0xc2   : > { %1141 = vmatprep.subr.bf16.mxu0 %v1629_v0 }
  0xc5   : > { %1142 = vmatpush3.bf16.msra.mxu0 %v1980_v7 }
  0xc6   : > { %1143 = vmatprep.subr.bf16.mxu0 %v1629_v0 }
  0xc9   : > { %1144 = vmatpush3.bf16.msra.mxu0 %v1984_v8 }
  0xca   : > { %1149 = vmatprep.subr.bf16.mxu0 (!%p1065_p4), %v1631_v17 }
  0xcc   : > { %1146 = vmatmul.mubr.bf16.vlgmr.msra.gmra.mrb[0].mxu0 %v1362_v9 }
  0xcd   : > { %1165 = vmatprep.mubr.msk.bf16.mxu0 (!%p1065_p4), %vm1632_vm1, %v1631_v17  ;;  %1150 = vmatpush3.bf16.msra.mxu0 (!%p1065_p4), %v1954_v1 }
  0xce   : > { %1151 = vmatprep.subr.bf16.mxu0 (!%p1065_p4), %v1631_v17 }
  0xd1   : > { %1152 = vmatpush3.bf16.msra.mxu0 (!%p1065_p4), %v1959_v2 }
  0xd2   : > { %1153 = vmatprep.subr.bf16.mxu0 (!%p1065_p4), %v1631_v17 }
  0xd5   : > { %1154 = vmatpush3.bf16.msra.mxu0 (!%p1065_p4), %v1963_v3 }
  0xd6   : > { %1155 = vmatprep.subr.bf16.mxu0 (!%p1065_p4), %v1631_v17 }
  0xd9   : > { %1156 = vmatpush3.bf16.msra.mxu0 (!%p1065_p4), %v1968_v4 }
  0xda   : > { %1157 = vmatprep.subr.bf16.mxu0 (!%p1065_p4), %v1631_v17 }
  0xdd   : > { %1158 = vmatpush3.bf16.msra.mxu0 (!%p1065_p4), %v1972_v5 }
  0xde   : > { %1159 = vmatprep.subr.bf16.mxu0 (!%p1065_p4), %v1631_v17 }
  0xe1   : > { %1160 = vmatpush3.bf16.msra.mxu0 (!%p1065_p4), %v1976_v6 }
  0xe2   : > { %1161 = vmatprep.subr.bf16.mxu0 (!%p1065_p4), %v1631_v17 }
  0xe5   : > { %1162 = vmatpush3.bf16.msra.mxu0 (!%p1065_p4), %v1980_v7 }
  0xe6   : > { %1163 = vmatprep.subr.bf16.mxu0 (!%p1065_p4), %v1631_v17 }
  0xe9   : > { %1164 = vmatpush3.bf16.msra.mxu0 (!%p1065_p4), %v1984_v8 }
 0x19e   : > { %497 = sbr.rel (%p1065_p4) target bundleno = 633 (0x279), region = 68 }
 0x19f   : > { %v475_v11 = vpop.f32.mrb[0].mxu0 }
 0x1a0   : > { %v476_v12 = vadd.f32 %v1991_v10, %v475_v11  ;;  %v1147_v13 = vpop.f32.mrb[1].mxu0 }
 0x1a1   : > { %v478_v14 = vpop.f32.mrb[2].mxu0 }
 0x1a2   : > { %492 = vst [vmem:[#allocation2 + $0x11] sm:$0xff] %v476_v12  ;;  %v479_v15 = vadd.f32 %v1991_v10, %v478_v14  ;;  %v1148_v16 = vpop.f32.mrb[3].mxu0  ;;  %1166 = vmatmul.mubr.bf16.vlgmr.msra.gmra.mrb[0].mxu0 (!%p1065_p4), %v505_v18 }
 0x1a4   : > { %493 = vst [vmem:[#allocation2 + $0x21] sm:$0xff] %v479_v15 }
 0x275   : > { %v540_v19 = vpop.f32.mrb[0].mxu0 }
 0x276   : > { %v541_v20 = vadd.f32 %v1991_v10, %v540_v19  ;;  %v1167_v21 = vpop.f32.mrb[1].mxu0 }
 0x277   : > { %v543_v22 = vpop.f32.mrb[2].mxu0 }
 0x278   : > { %546 = vst [vmem:[#allocation2 + $0x1] sm:$0xff] %v541_v20  ;;  %v1168_v23 = vpop.f32.mrb[3].mxu0 }
 0x279 PF: > { %p1070_p3 = scmp.ge.s32.totalorder %s1603_s30, 3 }
 0x27a   : > { %v1633_v24 = vmov (!%p1070_p3), 0.0   ;;  %vm1634_vm2 = vmmov (!%p1070_p3), 0   ;;  %s1092_s3 = sadd.s32 (!%p1070_p3), 16, %s1053_s14 }
 0x27b   : > { %550 = sbr.rel (%p1070_p3) target bundleno = 882 (0x372), region = 72  ;;  %1169 = vmatprep.subr.bf16.mxu0 (!%p1070_p3), %v1633_v24  ;;  %1185 = vmatprep.mubr.msk.bf16.mxu0 (!%p1070_p3), %vm1634_vm2, %v1633_v24  ;;  %s553_s20 = sshra.s32 (!%p1070_p3), %s1092_s3, 3 }
 0x27c   : > { %1170 = vmatpush3.bf16.msra.mxu0 (!%p1070_p3), %v1954_v1  ;;  %s1072_s15 = sshll.u32 (!%p1070_p3), %s553_s20, 2 }
 0x27d   : > { %1171 = vmatprep.subr.bf16.mxu0 (!%p1070_p3), %v1633_v24  ;;  %s556_s16 = scalar_lea.vmem (!%p1070_p3), %s1923_s17, %s1072_s15 [#allocation3] }
 0x27e   : > { %v557_v25 = vld [vmem:[%s556_s16] sm:$0xf] (!%p1070_p3) }
 0x280   : > { %1172 = vmatpush3.bf16.msra.mxu0 (!%p1070_p3), %v1959_v2 }
 0x281   : > { %1173 = vmatprep.subr.bf16.mxu0 (!%p1070_p3), %v1633_v24 }
 0x284   : > { %1174 = vmatpush3.bf16.msra.mxu0 %v1963_v3 }
 0x285   : > { %1175 = vmatprep.subr.bf16.mxu0 %v1633_v24 }
 0x288   : > { %1176 = vmatpush3.bf16.msra.mxu0 %v1968_v4 }
 0x289   : > { %1177 = vmatprep.subr.bf16.mxu0 %v1633_v24 }
 0x28c   : > { %1178 = vmatpush3.bf16.msra.mxu0 %v1972_v5 }
 0x28d   : > { %1179 = vmatprep.subr.bf16.mxu0 %v1633_v24 }
 0x290   : > { %1180 = vmatpush3.bf16.msra.mxu0 %v1976_v6 }
 0x291   : > { %1181 = vmatprep.subr.bf16.mxu0 %v1633_v24 }
 0x294   : > { %1182 = vmatpush3.bf16.msra.mxu0 %v1980_v7 }
 0x295   : > { %1183 = vmatprep.subr.bf16.mxu0 %v1633_v24 }
 0x298   : > { %1184 = vmatpush3.bf16.msra.mxu0 %v1984_v8 }
 0x29b   : > { %1186 = vmatmul.mubr.bf16.vlgmr.msra.gmra.mrb[0].mxu0 %v557_v25 }
 0x36e   : > { %v592_v26 = vpop.f32.mrb[0].mxu0 }
 0x36f   : > { %v593_v27 = vadd.f32 %v1991_v10, %v592_v26  ;;  %v1187_v28 = vpop.f32.mrb[1].mxu0 }
 0x370   : > { %v595_v29 = vpop.f32.mrb[2].mxu0 }
 0x371   : > { %598 = vst [vmem:[#allocation2 + $0x31] sm:$0xff] %v593_v27  ;;  %v1188_v30 = vpop.f32.mrb[3].mxu0 }
 0x372 PF: > { %1189 = vmatprep.subr.bf16.mxu0 %v1629_v0  ;;  %v1363_v31 = vld [vmem:[#allocation9] sm:$0xff]   ;;  %1205 = vmatprep.mubr.msk.bf16.mxu0 %vm1630_vm0, %v1629_v0  ;;  %v616_v32 = vlaneseq  ;;  %v1364_v33 = vld [vmem:[#allocation9 + $0x8] sm:$0xff]   ;;  %v1365_v35 = vld [vmem:[#allocation9 + $0x10] sm:$0xff]   ;;  %vm636_vm3 = vcmask 1046528   ;;  %vm659_vm4 = vcmask 1045504   ;;  %s2198_s19 = sld [smem:[#allocation24_spill]] }
 0x373   : > { %1190 = vmatpush3.bf16.msra.mxu0 %v1363_v31  ;;  %v1366_v42 = vld [vmem:[#allocation9 + $0x18] sm:$0xff]   ;;  %v599_v43 = vld [vmem:[#allocation2] sm:$0xff]  ;;  %v601_v46 = vld [vmem:[#allocation2 + $0x10] sm:$0xff]  ;;  %s2199_s24 = sld [smem:[#allocation17_spill]]  ;;  %s1085_s6 = sshll.u32 %s1603_s30, 1 }
 0x374   : > { %v617_v34 = vshrl.u32 %v616_v32, 7  ;;  %1191 = vmatprep.subr.bf16.mxu0 %v1629_v0  ;;  %v600_v45 = vld [vmem:[#allocation2 + $0x8] sm:$0x3]  ;;  %v607_v47 = vld [vmem:[#allocation8] sm:$0xff]  ;;  %v602_v49 = vld [vmem:[#allocation2 + $0x18] sm:$0x3] }
 0x375   : > { %v1367_v63 = vld [vmem:[#allocation9 + $0x20] sm:$0xff]   ;;  %v2037_v9 = vld [vmem:[#allocation2 + $0x20] sm:$0xff]  ;;  %v1368_v18 = vld [vmem:[#allocation9 + $0x28] sm:$0xff]   ;;  %s2200_s7 = sld [smem:[#allocation26_spill]]  ;;  %s2201_s12 = sld [smem:[#allocation18_spill]] }
 0x376   : > { %v618_v36 = vsub.s32 0, %v617_v34  ;;  %v626_v37 = vsub.s32 1, %v617_v34  ;;  %v649_v38 = vsub.s32 2, %v617_v34  ;;  %v672_v39 = vsub.s32 3, %v617_v34  ;;  %v604_v19 = vld [vmem:[#allocation2 + $0x28] sm:$0x3] }
 0x377   : > { %1192 = vmatpush3.bf16.msra.mxu0 %v1364_v33  ;;  %v680_v40 = vsub.s32 4, %v617_v34  ;;  %v702_v41 = vsub.s32 5, %v617_v34  ;;  %v724_v44 = vsub.s32 6, %v617_v34  ;;  %v732_v48 = vsub.s32 7, %v617_v34  ;;  %s915_s18 = sshll.u32 %s1996_s8, 4  ;;  %s2202_s15 = sld [smem:[#allocation27_spill]]  ;;  %s2077_s18 = int_to_ptr.vmem [resolvable:$true] %s915_s18 }
 0x378   : > { %1193 = vmatprep.subr.bf16.mxu0 %v1629_v0  ;;  %v619_v50 = vrot.slane %v607_v47, %v618_v36  ;;  %v627_v51 = vrot.slane %v607_v47, %v626_v37  ;;  %v650_v52 = vrot.slane %v607_v47, %v649_v38  ;;  %v673_v53 = vrot.slane %v607_v47, %v672_v39  ;;  %v1073_v54 = vld [vmem:[%s2198_s19] ss:$0 sm:$0xff]  ;;  %s2083_s30 = scalar_lea.sflag [#allocation5], %s352_s5  ;;  %s1489_s17 = scalar_lea.vmem %s2077_s18, 256 }
 0x379   : > { %v681_v55 = vrot.slane %v607_v47, %v680_v40  ;;  %v703_v56 = vrot.slane %v607_v47, %v702_v41  ;;  %v2032_v57 = vrot.slane %v607_v47, %v724_v44  ;;  %v2034_v58 = vrot.slane %v607_v47, %v732_v48  ;;  %v1369_v36 = vld [vmem:[#allocation9 + $0x30] sm:$0xff]   ;;  %v605_v41 = vld [vmem:[#allocation2 + $0x30] sm:$0xff]  ;;  %s1086_s22 = sshll.u32 %s2199_s24, 3  ;;  %p1490_p7 = scmp.ne.s32.totalorder %s2077_s18, %s1489_s17 }
 0x37a   : > { %v620_v59 = vmul.f32 %v619_v50, %v599_v43  ;;  %v621_v60 = vmul.f32 %v619_v50, %v601_v46  ;;  %v628_v61 = vmul.f32 %v627_v51, %v599_v43  ;;  %v629_v62 = vmul.f32 %v627_v51, %v600_v45  ;;  %s912_s4 = sadd.s32 %s1086_s22, %s1085_s6  ;;  %s1635_s14 = smov [#allocation11]  }
 0x37b   : > { %1194 = vmatpush3.bf16.msra.mxu0 %v1365_v35  ;;  %v630_v1 = vmul.f32 %v627_v51, %v601_v46  ;;  %v631_v2 = vmul.f32 %v627_v51, %v602_v49  ;;  %v651_v3 = vmul.f32 %v650_v52, %v599_v43  ;;  %v652_v4 = vmul.f32 %v650_v52, %v600_v45  ;;  %v606_v51 = vld [vmem:[#allocation2 + $0x38] sm:$0x3]  ;;  %s1087_s27 = sshll.u32 %s912_s4, 7  ;;  %p2203_p9 = scmp.ne.s32.totalorder %s2201_s12, 0 }
 0x37c   : > { %1195 = vmatprep.subr.bf16.mxu0 %v1629_v0  ;;  %v622_v5 = vadd.f32 %v1073_v54, %v620_v59  ;;  %v623_v6 = vadd.f32 %v1073_v54, %v621_v60  ;;  %v637_v7 = vrot.slane %v628_v61, 1  ;;  %v638_v8 = vrot.slane %v629_v62, 1  ;;  %v1370_v59 = vld [vmem:[#allocation9 + $0x38] sm:$0xff]   ;;  %s1493_s19 = sshll.u32 %s1635_s14, 4  ;;  %s1494_s19 = int_to_ptr.vmem [resolvable:$false] %s1493_s19 }
 0x37d   : > { %v640_v10 = vrot.slane %v630_v1, 1  ;;  %v641_v11 = vrot.slane %v631_v2, 1  ;;  %v653_v12 = vmul.f32 %v650_v52, %v601_v46  ;;  %v654_v13 = vmul.f32 %v650_v52, %v602_v49  ;;  %v1074_v52 = vld [vmem:[#allocation8 + $0x8] ss:$0 sm:$0xff]  ;;  %s2075_s16 = scalar_lea.hbm %s2202_s15, %s1087_s27  ;;  %p1491_p13 = pnand %p1490_p7, %p2203_p9 }
 0x37e   : > { %v639_v14 = vsel %vm636_vm3, %v637_v7, %v638_v8  ;;  %v660_v15 = vrot.slane %v651_v3, 2  ;;  %v661_v16 = vrot.slane %v652_v4, 2  ;;  %v674_v17 = vmul.f32 %v673_v53, %v601_v46  ;;  %s1495_s24 = scalar_lea.vmem %s1494_s19, 512  ;;  %p1496_p0 = scmp.lt.s32.totalorder %s2077_s18, %s1494_s19 }
 0x37f   : > { %1196 = vmatpush3.bf16.msra.mxu0 %v1366_v42  ;;  %v642_v20 = vsel %vm636_vm3, %v640_v10, %v641_v11  ;;  %v645_v21 = vadd.f32 %v639_v14, %v622_v5  ;;  %v663_v22 = vrot.slane %v653_v12, 2  ;;  %v664_v23 = vrot.slane %v654_v13, 2  ;;  %p1492_p11 = pneg %p1491_p13  ;;  %p1497_p5 = scmp.lt.s32.totalorder %s1495_s24, %s1489_s17 }
 0x380   : > { %1197 = vmatprep.subr.bf16.mxu0 %v1629_v0  ;;  %v646_v24 = vadd.f32 %v642_v20, %v623_v6  ;;  %v662_v25 = vsel %vm659_vm4, %v660_v15, %v661_v16  ;;  %v675_v26 = vmul.f32 %v673_v53, %v2037_v9  ;;  %v682_v27 = vmul.f32 %v681_v55, %v601_v46 }
 0x381   : > { %v665_v28 = vsel %vm659_vm4, %v663_v22, %v664_v23  ;;  %v668_v29 = vadd.f32 %v662_v25, %v645_v21  ;;  %v683_v30 = vmul.f32 %v681_v55, %v602_v49  ;;  %v684_v31 = vmul.f32 %v681_v55, %v2037_v9  ;;  %p1498_p8 = por %p1497_p5, %p1496_p0 }
 0x382   : > { %v669_v32 = vadd.f32 %v665_v28, %v646_v24  ;;  %v685_v33 = vmul.f32 %v681_v55, %v604_v19  ;;  %v690_v34 = vrot.slane %v682_v27, 1  ;;  %v704_v35 = vmul.f32 %v703_v56, %v601_v46 }
 0x383   : > { %1198 = vmatpush3.bf16.msra.mxu0 %v1367_v63  ;;  %v676_v37 = vadd.f32 %v674_v17, %v668_v29  ;;  %v691_v38 = vrot.slane %v683_v30, 1  ;;  %v693_v39 = vrot.slane %v684_v31, 1  ;;  %v705_v40 = vmul.f32 %v703_v56, %v602_v49  ;;  %p1499_p12 = pnand %p1498_p8, %p1492_p11 }
 0x384   : > { %1199 = vmatprep.subr.bf16.mxu0 %v1629_v0  ;;  %v677_v42 = vadd.f32 %v675_v26, %v669_v32  ;;  %v694_v43 = vrot.slane %v685_v33, 1  ;;  %v706_v44 = vmul.f32 %v703_v56, %v2037_v9  ;;  %v707_v45 = vmul.f32 %v703_v56, %v604_v19 }
 0x385   : > { %v692_v47 = vsel %vm636_vm3, %v690_v34, %v691_v38  ;;  %v712_v48 = vrot.slane %v704_v35, 2  ;;  %v713_v50 = vrot.slane %v705_v40, 2  ;;  %v726_v46 = vmul.f32 %v2032_v57, %v2037_v9 }
 0x386   : > { %v695_v53 = vsel %vm636_vm3, %v693_v39, %v694_v43  ;;  %v698_v49 = vadd.f32 %v692_v47, %v676_v37  ;;  %v715_v54 = vrot.slane %v706_v44, 2  ;;  %v716_v55 = vrot.slane %v707_v45, 2 }
 0x387   : > { %1200 = vmatpush3.bf16.msra.mxu0 %v1368_v18  ;;  %v699_v60 = vadd.f32 %v695_v53, %v677_v42  ;;  %v714_v61 = vsel %vm659_vm4, %v712_v48, %v713_v50  ;;  %v727_v56 = vmul.f32 %v2032_v57, %v605_v41  ;;  %v734_v62 = vmul.f32 %v2034_v58, %v2037_v9 }
 0x388   : > { %1201 = vmatprep.subr.bf16.mxu0 %v1629_v0  ;;  %v717_v63 = vsel %vm659_vm4, %v715_v54, %v716_v55  ;;  %v720_v1 = vadd.f32 %v714_v61, %v698_v49  ;;  %v735_v2 = vmul.f32 %v2034_v58, %v604_v19  ;;  %v736_v3 = vmul.f32 %v2034_v58, %v605_v41 }
 0x389   : > { %v721_v4 = vadd.f32 %v717_v63, %v699_v60  ;;  %v737_v5 = vmul.f32 %v2034_v58, %v606_v51  ;;  %v742_v6 = vrot.slane %v734_v62, 1  ;;  %v756_v7 = vmul.f32 %v1074_v52, %v2037_v9 }
 0x38a   : > { %v728_v8 = vadd.f32 %v726_v46, %v720_v1  ;;  %v743_v57 = vrot.slane %v735_v2, 1  ;;  %v745_v10 = vrot.slane %v736_v3, 1  ;;  %v757_v11 = vmul.f32 %v1074_v52, %v604_v19 }
 0x38b   : > { %1202 = vmatpush3.bf16.msra.mxu0 %v1369_v36  ;;  %v729_v12 = vadd.f32 %v727_v56, %v721_v4  ;;  %v758_v13 = vmul.f32 %v1074_v52, %v605_v41  ;;  %v759_v14 = vmul.f32 %v1074_v52, %v606_v51  ;;  %v764_v16 = vrot.slane %v756_v7, 2  ;;  %v1075_v36 = vld [vmem:[%s2200_s7] ss:$0 sm:$0xff] }
 0x38c   : > { %1203 = vmatprep.subr.bf16.mxu0 %v1629_v0  ;;  %v746_v0 = vrot.slane %v737_v5, 1  ;;  %v744_v15 = vsel %vm636_vm3, %v742_v6, %v743_v57  ;;  %v765_v17 = vrot.slane %v757_v11, 2 }
 0x38d   : > { %v750_v20 = vadd.f32 %v744_v15, %v728_v8  ;;  %v767_v58 = vrot.slane %v758_v13, 2  ;;  %v768_v21 = vrot.slane %v759_v14, 2 }
 0x38e   : > { %v747_v18 = vsel %vm636_vm3, %v745_v10, %v746_v0  ;;  %v766_v9 = vsel %vm659_vm4, %v764_v16, %v765_v17 }
 0x38f   : > { %1204 = vmatpush3.bf16.msra.mxu0 %v1370_v59  ;;  %v751_v22 = vadd.f32 %v747_v18, %v729_v12  ;;  %v769_v23 = vsel %vm659_vm4, %v767_v58, %v768_v21  ;;  %v772_v19 = vadd.f32 %v766_v9, %v750_v20 }
 0x391   : > { %v773_v24 = vadd.f32 %v769_v23, %v751_v22  ;;  %v776_v25 = vmul.f32 0.70710677, %v772_v19  ;;  %v774_v27 = vmul.f32 0.5, %v772_v19 }
 0x393   : > { %v777_v26 = vmul.f32 0.70710677, %v773_v24  ;;  %1371 = verf.f32 %v776_v25  ;;  %v775_v29 = vmul.f32 0.5, %v773_v24 }
 0x395   : > { %1373 = verf.f32 %v777_v26 }
 0x39d   : > { %v1372_v28 = vpop.eup %1371 }
 0x39e   : > { %v780_v31 = vadd.f32 1.0, %v1372_v28 }
 0x39f   : > { %v1374_v30 = vpop.eup %1373 }
 0x3a0   : > { %v781_v32 = vadd.f32 1.0, %v1374_v30  ;;  %v782_v33 = vmul.f32 %v780_v31, %v774_v27 }
 0x3a2   : > { %v783_v34 = vmul.f32 %v781_v32, %v775_v29 }
 0x3a4   : > { %v784_v35 = vpack.c.bf16 %v783_v34, %v782_v33 }
 0x3a6   : > { %1206 = vmatmul.mubr.bf16.vlgmr.msra.gmra.mrb[0].mxu0 %v784_v35 }
 0x479   : > { %v890_v37 = vpop.f32.mrb[0].mxu0 }
 0x47a   : > { %v891_v38 = vadd.f32 %v1075_v36, %v890_v37  ;;  %v1207_v39 = vpop.f32.mrb[1].mxu0 }
 0x47b   : > { %v893_v40 = vpop.f32.mrb[2].mxu0 }
 0x47c   : > { %897 = vst [vmem:[%s1996_s8] sm:$0xff] %v891_v38  ;;  %v894_v41 = vadd.f32 %v1075_v36, %v893_v40  ;;  %v1208_v42 = vpop.f32.mrb[3].mxu0 }
 0x47e   : > { %898 = vst [vmem:[%s1996_s8 + $0x8] sm:$0xff] %v894_v41 }
 0x47f   : > { %1502 = shalt.err (!%p1499_p12)
}
 0x480   : > { %s1503_s5 = scalar_lea.hbm %s2075_s16, 256  ;;  %s1507_s22 = scalar_lea.hbm %s2202_s15, 2048 }
 0x481   : > { %p1504_p2 = scmp.ne.s32.totalorder %s2075_s16, %s1503_s5  ;;  %p1508_p1 = scmp.lt.u32.totalorder %s2075_s16, %s2202_s15 }
 0x482   : > { %p1509_p4 = scmp.lt.u32.totalorder %s1507_s22, %s1503_s5  ;;  %p1511_p7 = scmp.lt.u32.totalorder %s1503_s5, %s2075_s16 }
 0x483   : > { %p1505_p6 = pnand %p1504_p2, %p2203_p9 }
 0x484   : > { %p1510_p3 = por %p1509_p4, %p1508_p1 }
 0x485   : > { %p1506_p10 = pneg %p1505_p6 }
 0x486   : > { %p1512_p13 = por %p1511_p7, %p1510_p3 }
 0x488   : > { %p1513_p11 = pnand %p1512_p13, %p1506_p10 }
 0x48a   : > { %1516 = shalt.err (!%p1513_p11)
}
 0x48b   : > { %s1636_s23 = smov 128   ;;  %s1637_s7 = smov 8  }
 0x48c   : > { %1223 = dma.vmem_to_hbm [thread:$0]  (%p2203_p9), %s2077_s18, 256, %s2075_s16, %s2083_s30, %s1636_s23, %s1636_s23, %s1637_s7  }
 0x48d PF: > { %s2204_s27 = sld [smem:[#allocation16_spill]]  ;;  %s2205_s3 = sld [smem:[#allocation19_spill]] }
 0x48e   : > { %p1250_p0 = scmp.ge.s32.totalorder %s1619_s11, 2 }
 0x493   : > { %s930_s20 = sand.u32 1, %s2204_s27   ;;  %p2206_p5 = scmp.ne.s32.totalorder %s2205_s3, 0 }
 0x494   : > { %s931_s17 = scalar_lea.sflag [#allocation5], %s930_s20 }
 0x495   : > { %p1240_p8 = pnand %p1250_p0, %p2206_p5 }
 0x497   : > { %1574 = dma.done.wait (!%p1240_p8), %s931_s17, 256  }
 0x498   : > { %1576 = vsyncadd (!%p1240_p8), %s931_s17, 4294967040  ;;  %s25_s11 = sadd.s32 1, %s1619_s11   ;;  %s2207_s12 = sld [smem:[#allocation20_spill]] }
 0x499   : > { %p22_p12 = scmp.ge.s32.totalorder %s25_s11, 10   ;;  %s2208_s18 = sld [smem:[#allocation21_spill]] }
 0x49a   : > { %s2209_s24 = smov %s1583_s25  ;;  %s2210_s25 = smov %s1587_s26 }
 0x49b   : > { %s2211_s26 = smov %s1872_s1  ;;  %s2212_s27 = smov %s1595_s28 }
 0x49c   : > { %s2213_s28 = smov %s1599_s29  ;;  %s2214_s29 = smov %s1867_s21 }
 0x49d   : > { %s2215_s30 = smov %s1611_s9  ;;  %s2216_s8 = smov %s1615_s10 }
 0x49e   : > { %s2217_s9 = smov %s2207_s12  ;;  %24 = sbr.rel (!%p22_p12) target bundleno = 18 (0x12), region = 118 }
 0x49f   : > { %s2218_s10 = smov %s2208_s18 }
 0x4a5   :  { %936 = vsyncpa [#allocation4], 1 }
 0x4a6   :  { %938 = vsyncpa [#allocation4 + $0x1], 1 }
 0x4a7   :  { %939 = vsyncpa [#allocation7], 1 }
 0x4a8   :  { %940 = vsyncpa [#allocation10], 1 }
 0x4a9   :  { %941 = vsyncpa [#allocation5], 1 }
 0x4aa   :  { %943 = vsyncpa [#allocation5 + $0x1], 1 }

// kernel: tpu_custom_call.1
= control target key start
LH: loop header
LB: loop body
LE: loop exit
PB: predicated region body
PF: predicated region fallthrough
CT: control target
= control target key end

     0   :  { %s2144_s0 = inlined_call_operand.hbm [shape: bf16[2,64,128], index: 0, kind: input, shape index: {}]   ;;  %s2145_s1 = inlined_call_operand.hbm [shape: bf16[128,128], index: 1, kind: input, shape index: {}]   ;;  %s2146_s2 = inlined_call_operand.vmem [shape: f32[1,128], index: 2, kind: input, shape index: {}]   ;;  %s2147_s3 = inlined_call_operand.hbm [shape: f32[9,128], index: 3, kind: input, shape index: {}]   ;;  %s2148_s4 = inlined_call_operand.vmem [shape: f32[1,128], index: 4, kind: input, shape index: {}]   ;;  %s2149_s5 = inlined_call_operand.hbm [shape: bf16[128,128], index: 5, kind: input, shape index: {}]   ;;  %s2150_s6 = inlined_call_operand.vmem [shape: f32[1,128], index: 6, kind: input, shape index: {}]   ;;  %s2151_s7 = inlined_call_operand.hbm [shape: f32[2,64,128], index: 7, kind: output, shape index: {}]  }
   0x1   :  { %2168 = sst [smem:[#allocation22_spill]] %s2145_s1 }
   0x2   :  { %2169 = sst [smem:[#allocation23_spill]] %s2147_s3 }
   0x3   :  { %2170 = sst [smem:[#allocation24_spill]] %s2148_s4 }
   0x4   :  { %2171 = sst [smem:[#allocation25_spill]] %s2149_s5 }
   0x5   :  { %2172 = sst [smem:[#allocation26_spill]] %s2150_s6 }
   0x6   :  { %2173 = sst [smem:[#allocation27_spill]] %s2151_s7 }
   0x7   :  { %12 = vsyncpa [#allocation4], 0 }
   0x8   :  { %14 = vsyncpa [#allocation4 + $0x1], 0 }
   0x9   :  { %15 = vsyncpa [#allocation7], 0 }
   0xa   :  { %16 = vsyncpa [#allocation10], 0 }
   0xb   :  { %17 = vsyncpa [#allocation5], 0 }
   0xc   :  { %19 = vsyncpa [#allocation5 + $0x1], 0  ;;  %s1678_s24 = smov 0   ;;  %s1680_s25 = smov 0  }
   0xd   :  { %s1682_s26 = smov 0   ;;  %s1684_s27 = smov 0  }
   0xe   :  { %s1686_s28 = smov 0   ;;  %s1688_s29 = smov 0  }
   0xf   :  { %s1690_s30 = smov 0   ;;  %s1692_s8 = smov 0  }
  0x10   :  { %s1694_s9 = smov 0   ;;  %s1696_s10 = smov 0  }
  0x11   :  { %s1698_s11 = smov 0  }
  0x12 LB: > { %2174 = sst [smem:[#allocation16_spill]] %s1579_s24  ;;  %s1037_s12 = sadd.s32 4294967295, %s1619_s11   ;;  %s1619_s11 = sphi %s1698_s11, %s25_s11   ;;  %s1615_s10 = sphi %s1696_s10, %s2218_s10   ;;  %s1611_s9 = sphi %s1694_s9, %s2217_s9   ;;  %s1607_s8 = sphi %s1692_s8, %s2216_s8   ;;  %s1603_s30 = sphi %s1690_s30, %s2215_s30   ;;  %s1599_s29 = sphi %s1688_s29, %s2214_s29   ;;  %s1595_s28 = sphi %s1686_s28, %s2213_s28   ;;  %s1591_s27 = sphi %s1684_s27, %s2212_s27   ;;  %s1587_s26 = sphi %s1682_s26, %s2211_s26   ;;  %s1583_s25 = sphi %s1680_s25, %s2210_s25   ;;  %s1579_s24 = sphi %s1678_s24, %s2209_s24  }
  0x13   : > { %2175 = sst [smem:[#allocation17_spill]] %s1607_s8  ;;  %s1038_s13 = sadd.s32 4294967294, %s1619_s11  }
  0x14   : > { %p57_p0 = scmp.ne.s32.totalorder %s1595_s28, %s1591_s27  ;;  %p1734_p1 = scmp.eq.s32.totalorder %s1037_s12, 0 }
  0x15   : > { %p208_p2 = scmp.ne.s32.totalorder %s1587_s26, %s1583_s25  ;;  %p209_p4 = scmp.eq.s32.totalorder %s1037_s12, 7 }
  0x16   : > { %s2176_s14 = scalar_select %p1734_p1, 1, 0 }
  0x17   : > { %p1743_p3 = por %p1734_p1, %p57_p0  ;;  %p214_p5 = scmp.ne.s32.totalorder %s1583_s25, %s1579_s24 }
  0x18   : > { %p215_p6 = scmp.eq.s32.totalorder %s1038_s13, 7  ;;  %p1749_p7 = por %p209_p4, %p208_p2 }
  0x19   : > { %s2177_s16 = scalar_select %p1743_p3, 1, 0 }
  0x1a   : > { %s2178_s17 = scalar_select %p1749_p7, 1, 0 }
  0x1b   : > { %p1039_p8 = scmp.ge.s32.totalorder %s1619_s11, 1  ;;  %p1754_p9 = por %p215_p6, %p214_p5 }
  0x1c   : > { %2179 = sst [smem:[#allocation18_spill]] %s2178_s17  ;;  %p222_p10 = scmp.lt.s32.totalorder %s1619_s11, 9 }
  0x1d   : > { %s2180_s18 = scalar_select %p1754_p9, 1, 0 }
  0x1e   : > { %p1759_p11 = pnand %p1039_p8, %p222_p10  ;;  %s1621_s20 = smov [#allocation6]  }
  0x1f   : > { %2181 = sst [smem:[#allocation19_spill]] %s2180_s18  ;;  %s234_s21 = sshll.u32 %s1621_s20, 4  ;;  %s235_s21 = int_to_ptr.vmem [resolvable:$true] %s234_s21 }
  0x20   : > { %s2182_s19 = scalar_select %p1759_p11, 1, 0 }
  0x21   : > { %p1225_p12 = pneg %p1759_p11  ;;  %s1622_s23 = smov [#allocation8]  }
  0x22   : > { %s250_s27 = sshll.u32 %s1622_s23, 4  ;;  %s2184_s1 = sld [smem:[#allocation22_spill]]  ;;  %s1771_s27 = int_to_ptr.vmem [resolvable:$true] %s250_s27 }
  0x23   : > { %p1767_p13 = pnand %p1225_p12, %p1734_p1 }
  0x25   : > { %p1781_p2 = pneg %p1767_p13 }
  0x28   : > { %s1375_s15 = scalar_lea.hbm %s2184_s1, 1024 }
  0x29   : > { %p1376_p0 = scmp.ne.s32.totalorder %s2184_s1, %s1375_s15  ;;  %p1382_p6 = scmp.lt.u32.totalorder %s1375_s15, %s2184_s1 }
  0x2b   : > { %p1378_p4 = pnand %p1781_p2, %p1376_p0 }
  0x2d   : > { %p1379_p5 = pneg %p1378_p4 }
  0x2f   : > { %p1384_p8 = pnand %p1382_p6, %p1379_p5 }
  0x31   : > { %1387 = shalt.err (!%p1384_p8)
}
  0x32   : > { %s1388_s12 = scalar_lea.vmem %s235_s21, 1024  ;;  %p1396_p7 = scmp.lt.s32.totalorder %s235_s21, %s235_s21 }
  0x33   : > { %p1389_p10 = scmp.ne.s32.totalorder %s235_s21, %s1388_s12  ;;  %p1397_p1 = scmp.lt.s32.totalorder %s1388_s12, %s1388_s12 }
  0x35   : > { %p1391_p12 = pnand %p1389_p10, %p1781_p2  ;;  %p1398_p3 = por %p1397_p1, %p1396_p7 }
  0x37   : > { %p1392_p9 = pneg %p1391_p12 }
  0x39   : > { %p1399_p11 = pnand %p1398_p3, %p1392_p9 }
  0x3b   : > { %1402 = shalt.err (!%p1399_p11)
}
  0x3c   : > { %s2162_s24 = smov 64   ;;  %s2164_s18 = smov 4  }
  0x3d   : > { %1228 = dma.hbm_to_vmem [thread:$0]  (!%p1767_p13), %s2184_s1, 1024, %s235_s21, [#allocation7], %s2162_s24, %s2162_s24, %s2164_s18  }
  0x3e   : > { %s2186_s3 = sld [smem:[#allocation23_spill]] }
  0x44   : > { %s1403_s17 = scalar_lea.hbm %s2186_s3, 256 }
  0x45   : > { %p1404_p1 = scmp.ne.s32.totalorder %s2186_s3, %s1403_s17  ;;  %p1410_p9 = scmp.lt.u32.totalorder %s1403_s17, %s2186_s3 }
  0x47   : > { %p1406_p3 = pnand %p1404_p1, %p1781_p2 }
  0x49   : > { %p1407_p7 = pneg %p1406_p3 }
  0x4b   : > { %p1412_p11 = pnand %p1410_p9, %p1407_p7 }
  0x4d   : > { %1415 = shalt.err (!%p1412_p11)
}
  0x4e   : > { %s1416_s21 = scalar_lea.vmem %s1771_s27, 256  ;;  %p1424_p6 = scmp.lt.s32.totalorder %s1771_s27, %s1771_s27 }
  0x4f   : > { %p1417_p0 = scmp.ne.s32.totalorder %s1771_s27, %s1416_s21  ;;  %p1425_p8 = scmp.lt.s32.totalorder %s1416_s21, %s1416_s21 }
  0x51   : > { %p1419_p4 = pnand %p1417_p0, %p1781_p2  ;;  %p1426_p10 = por %p1425_p8, %p1424_p6 }
  0x53   : > { %p1420_p5 = pneg %p1419_p4 }
  0x55   : > { %p1427_p12 = pnand %p1426_p10, %p1420_p5 }
  0x57   : > { %1430 = shalt.err (!%p1427_p12)
}
  0x58   : > { %s1625_s6 = smov 128   ;;  %s1626_s4 = smov 8  }
  0x59   : > { %1231 = dma.hbm_to_vmem [thread:$0]  (!%p1767_p13), %s2186_s3, 256, %s1771_s27, [#allocation7], %s1625_s6, %s1625_s6, %s1626_s4  }
  0x5a   : > { %s1627_s7 = smov [#allocation9]   ;;  %s2187_s5 = sld [smem:[#allocation25_spill]] }
  0x5b   : > { %s266_s15 = sshll.u32 %s1627_s7, 4  ;;  %s267_s15 = int_to_ptr.vmem [resolvable:$true] %s266_s15 }
  0x60   : > { %s1431_s12 = scalar_lea.hbm %s2187_s5, 1024 }
  0x61   : > { %p1432_p1 = scmp.ne.s32.totalorder %s2187_s5, %s1431_s12  ;;  %p1438_p9 = scmp.lt.u32.totalorder %s1431_s12, %s2187_s5 }
  0x63   : > { %p1434_p3 = pnand %p1432_p1, %p1781_p2 }
  0x65   : > { %p1435_p7 = pneg %p1434_p3 }
  0x67   : > { %p1440_p11 = pnand %p1438_p9, %p1435_p7 }
  0x69   : > { %1443 = shalt.err (!%p1440_p11)
}
  0x6a   : > { %s1444_s27 = scalar_lea.vmem %s267_s15, 1024  ;;  %p1452_p6 = scmp.lt.s32.totalorder %s267_s15, %s267_s15 }
  0x6b   : > { %p1445_p0 = scmp.ne.s32.totalorder %s267_s15, %s1444_s27  ;;  %p1453_p8 = scmp.lt.s32.totalorder %s1444_s27, %s1444_s27 }
  0x6d   : > { %p1447_p4 = pnand %p1445_p0, %p1781_p2  ;;  %p1454_p10 = por %p1453_p8, %p1452_p6 }
  0x6f   : > { %p1448_p5 = pneg %p1447_p4 }
  0x71   : > { %p1455_p12 = pnand %p1454_p10, %p1448_p5 }
  0x73   : > { %1458 = shalt.err (!%p1455_p12)
}
  0x74   : > { %s2188_s24 = smov 4   ;;  %s2189_s6 = smov 64  }
  0x75   : > { %1234 = dma.hbm_to_vmem [thread:$0]  (!%p1767_p13), %s2187_s5, 1024, %s267_s15, [#allocation10], %s2189_s6, %s2189_s6, %s2188_s24  }
  0x76   : > { %s34_s20 = sadd.s32 1, %s1611_s9  ;;  %s37_s22 = sadd.s32 1, %s1615_s10 }
  0x77   : > { %p35_p2 = scmp.ge.s32.totalorder %s34_s20, 4  ;;  %s44_s4 = sadd.s32 1, %s1599_s29 }
  0x78   : > { %p51_p1 = scmp.ne.s32.totalorder %s1599_s29, %s1595_s28  ;;  %p52_p3 = scmp.eq.s32.totalorder %s1619_s11, 0 }
  0x79   : > { %s2220_s20 = smov (%p35_p2, %s34_s20), 0  ;;  %s2222_s22 = smov (!%p35_p2, %s37_s22), %s1615_s10 }
  0x7a   : > { %2190 = sst [smem:[#allocation20_spill]] %s2220_s20  ;;  %s194_s8 = ssub.s32 %s1611_s9, %s2220_s20 }
  0x7b   : > { %p39_p7 = scmp.ge.s32.totalorder %s2222_s22, 2  ;;  %p1246_p9 = scmp.lt.s32.totalorder %s1619_s11, 8 }
  0x7c   : > { %p1856_p13 = por %p52_p3, %p51_p1  ;;  %s283_s7 = sand.u32 1, %s1599_s29  }
  0x7d   : > { %s2224_s22 = smov (%p39_p7, %s2222_s22), 0  ;;  %s1044_s15 = sshll.u32 %s283_s7, 5 }
  0x7e   : > { %2192 = sst [smem:[#allocation21_spill]] %s2224_s22  ;;  %s41_s13 = ssub.s32 %s1615_s10, %s2224_s22 }
  0x7f   : > { %p42_p11 = scmp.eq.s32.totalorder %s41_s13, 0  ;;  %s195_s23 = sor.u32 %s194_s8, %s41_s13 }
  0x80   : > { %p196_p0 = scmp.eq.s32.totalorder %s195_s23, 0  ;;  %s1090_s12 = sshll.u32 %s1615_s10, 9 }
  0x81   : > { %s1867_s21 = scalar_select %p42_p11, %s1599_s29, %s44_s4  }
  0x82   : > { %s2193_s27 = sadd.s32 1, %s1587_s26  ;;  %s1877_s5 = scalar_lea.hbm %s2144_s0, %s1090_s12 }
  0x83   : > { %s1872_s1 = scalar_select %p196_p0, %s1587_s26, %s2193_s27  }
  0x84   : > { %s287_s20 = scalar_lea.vmem [#allocation3], %s1044_s15  ;;  %p1885_p4 = pnand %p1246_p9, %p1856_p13 }
  0x85   : > { %s294_s22 = sshll.u32 %s287_s20, 4  ;;  %s1889_s8 = scalar_lea.sflag [#allocation4], %s283_s7  ;;  %s1879_s22 = int_to_ptr.vmem [resolvable:$true] %s294_s22 }
  0x86   : > { %s1459_s3 = scalar_lea.hbm %s1877_s5, 512  ;;  %p1461_p6 = pneg %p1885_p4 }
  0x87   : > { %p1460_p5 = scmp.ne.s32.totalorder %s1877_s5, %s1459_s3  ;;  %s1464_s17 = scalar_lea.hbm %s2144_s0, 1024 }
  0x88   : > { %p1465_p12 = scmp.lt.u32.totalorder %s1877_s5, %s2144_s0  ;;  %p1466_p2 = scmp.lt.u32.totalorder %s1464_s17, %s1459_s3 }
  0x89   : > { %p1462_p8 = pnand %p1461_p6, %p1460_p5  ;;  %p1468_p3 = scmp.lt.u32.totalorder %s1459_s3, %s1877_s5 }
  0x8a   : > { %p1467_p1 = por %p1466_p2, %p1465_p12 }
  0x8b   : > { %p1463_p10 = pneg %p1462_p8 }
  0x8c   : > { %p1469_p7 = por %p1468_p3, %p1467_p1 }
  0x8e   : > { %p1470_p9 = pnand %p1469_p7, %p1463_p10 }
  0x90   : > { %1473 = shalt.err (!%p1470_p9)
}
  0x91   : > { %s1474_s7 = scalar_lea.vmem %s1879_s22, 512  ;;  %s1628_s12 = smov [#allocation3]  }
  0x92   : > { %p1475_p13 = scmp.ne.s32.totalorder %s1879_s22, %s1474_s7  ;;  %s1479_s27 = sshll.u32 %s1628_s12, 4  ;;  %s1480_s27 = int_to_ptr.vmem [resolvable:$false] %s1479_s27 }
  0x93   : > { %s1481_s18 = scalar_lea.vmem %s1480_s27, 1024  ;;  %p1482_p5 = scmp.lt.s32.totalorder %s1879_s22, %s1480_s27 }
  0x94   : > { %p1477_p11 = pnand %p1475_p13, %p1461_p6  ;;  %p1483_p8 = scmp.lt.s32.totalorder %s1481_s18, %s1474_s7 }
  0x96   : > { %p1478_p0 = pneg %p1477_p11  ;;  %p1484_p12 = por %p1483_p8, %p1482_p5 }
  0x98   : > { %p1485_p2 = pnand %p1484_p12, %p1478_p0 }
  0x9a   : > { %1488 = shalt.err (!%p1485_p2)
}
  0x9b   : > { %1238 = dma.hbm_to_vmem [thread:$0]  (!%p1885_p4), %s1877_s5, 512, %s1879_s22, %s1889_s8, %s2189_s6, %s2189_s6, %s2188_s24  }
  0x9c   : > { %p2195_p6 = scmp.ne.s32.totalorder %s2182_s19, 0 }
  0x9d   : > { %s308_s3 = sand.u32 (!%p2195_p6), 1, %s1595_s28   ;;  %p2196_p10 = scmp.ne.s32.totalorder (!%p2195_p6), %s2177_s16, 0 }
  0x9e   : > { %306 = sbr.rel (%p2195_p6) target bundleno = 1165 (0x48d), region = 48  ;;  %s1048_s20 = sshll.u32 (!%p2195_p6), %s308_s3, 5 }
  0x9f   : > { %s309_s15 = scalar_lea.sflag (!%p2195_p6), [#allocation4], %s308_s3  ;;  %s1923_s17 = scalar_lea.vmem (!%p2195_p6), [#allocation3], %s1048_s20 }
  0xa5   : > { %1562 = dma.done.wait (%p2196_p10), %s309_s15, 512  }
  0xa6   : > { %1564 = vsyncadd (%p2196_p10), %s309_s15, 4294966784  ;;  %p2197_p1 = scmp.ne.s32.totalorder %s2176_s14, 0 }
  0xa8   : > { %1566 = dma.done.wait (%p2197_p1), [#allocation7], 1280  }
  0xa9   : > { %1568 = vsyncadd (%p2197_p1), [#allocation7], 4294966016 }
  0xaa   : > { %1570 = dma.done.wait (%p2197_p1), [#allocation10], 1024  }
  0xab   : > { %1572 = vsyncadd (%p2197_p1), [#allocation10], 4294966272  ;;  %s352_s5 = sand.u32 1, %s1583_s25   ;;  %v1629_v0 = vmov 0.0   ;;  %vm1630_vm0 = vmmov 0   ;;  %s1053_s14 = sshll.u32 %s1603_s30, 4 }
  0xac   : > { %s1940_s16 = sshll.u32 %s352_s5, 4  ;;  %1129 = vmatprep.subr.bf16.mxu0 %v1629_v0  ;;  %482 = vst [vmem:[#allocation2] sm:$0xff] %v1629_v0  ;;  %483 = vst [vmem:[#allocation2 + $0x8] sm:$0x3] %v1629_v0  ;;  %1145 = vmatprep.mubr.msk.bf16.mxu0 %vm1630_vm0, %v1629_v0  ;;  %v1954_v1 = vld [vmem:[#allocation6] sm:$0xff]   ;;  %s375_s19 = sshra.s32 %s1053_s14, 3 }
  0xad   : > { %485 = vst [vmem:[#allocation2 + $0x30] sm:$0xff] %v1629_v0  ;;  %486 = vst [vmem:[#allocation2 + $0x38] sm:$0x3] %v1629_v0  ;;  %1130 = vmatpush3.bf16.msra.mxu0 %v1954_v1  ;;  %v1959_v2 = vld [vmem:[#allocation6 + $0x8] sm:$0xff]   ;;  %s1054_s24 = sshll.u32 %s375_s19, 2  ;;  %v1963_v3 = vld [vmem:[#allocation6 + $0x10] sm:$0xff]  }
  0xae   : > { %488 = vst [vmem:[#allocation2 + $0x10] sm:$0x1] %v1629_v0  ;;  %489 = vst [vmem:[#allocation2 + $0x20] sm:$0x1] %v1629_v0  ;;  %1131 = vmatprep.subr.bf16.mxu0 %v1629_v0  ;;  %s378_s6 = scalar_lea.vmem %s1923_s17, %s1054_s24 [#allocation3]  ;;  %v1968_v4 = vld [vmem:[#allocation6 + $0x18] sm:$0xff]   ;;  %v1972_v5 = vld [vmem:[#allocation6 + $0x20] sm:$0xff]  }
  0xaf   : > { %490 = vst [vmem:[#allocation2 + $0x19] sm:$0x1] %v1629_v0  ;;  %491 = vst [vmem:[#allocation2 + $0x29] sm:$0x1] %v1629_v0  ;;  %v1976_v6 = vld [vmem:[#allocation6 + $0x28] sm:$0xff]   ;;  %v1980_v7 = vld [vmem:[#allocation6 + $0x30] sm:$0xff]  }
  0xb0   : > { %v1984_v8 = vld [vmem:[#allocation6 + $0x38] sm:$0xff]   ;;  %v1362_v9 = vld [vmem:[%s378_s6] sm:$0xff]   ;;  %s1996_s8 = scalar_lea.vmem [#allocation11], %s1940_s16  ;;  %p1065_p4 = scmp.le.s32.totalorder %s1603_s30, 0 }
  0xb1   : > { %1132 = vmatpush3.bf16.msra.mxu0 %v1959_v2  ;;  %v1991_v10 = vld [vmem:[%s2146_s2] ss:$0 sm:$0xff]  ;;  %v1631_v17 = vmov (!%p1065_p4), 0.0   ;;  %vm1632_vm1 = vmmov (!%p1065_p4), 0   ;;  %s1066_s13 = sshll.u32 (!%p1065_p4), %s1603_s30, 1 }
  0xb2   : > { %1133 = vmatprep.subr.bf16.mxu0 %v1629_v0  ;;  %s1067_s23 = sadd.s32 (!%p1065_p4), 4294967295, %s1066_s13 }
  0xb3   : > { %s1068_s7 = sshll.u32 (!%p1065_p4), %s1067_s23, 3 }
  0xb4   : > { %s501_s12 = sshra.s32 (!%p1065_p4), %s1068_s7, 3 }
  0xb5   : > { %1134 = vmatpush3.bf16.msra.mxu0 %v1963_v3  ;;  %s1069_s27 = sshll.u32 (!%p1065_p4), %s501_s12, 2 }
  0xb6   : > { %1135 = vmatprep.subr.bf16.mxu0 %v1629_v0  ;;  %s504_s18 = scalar_lea.vmem (!%p1065_p4), %s1923_s17, %s1069_s27 [#allocation3] }
  0xb7   : > { %v505_v18 = vld [vmem:[%s504_s18] sm:$0xf] (!%p1065_p4) }
  0xb9   : > { %1136 = vmatpush3.bf16.msra.mxu0 %v1968_v4 }
  0xba   : > { %1137 = vmatprep.subr.bf16.mxu0 %v1629_v0 }
  0xbd   : > { %1138 = vmatpush3.bf16.msra.mxu0 %v1972_v5 }
  0xbe   : > { %1139 = vmatprep.subr.bf16.mxu0 %v1629_v0 }
  0xc1   : > { %1140 = vmatpush3.bf16.msra.mxu0 %v1976_v6 }
  0xc2   : > { %1141 = vmatprep.subr.bf16.mxu0 %v1629_v0 }
  0xc5   : > { %1142 = vmatpush3.bf16.msra.mxu0 %v1980_v7 }
  0xc6   : > { %1143 = vmatprep.subr.bf16.mxu0 %v1629_v0 }
  0xc9   : > { %1144 = vmatpush3.bf16.msra.mxu0 %v1984_v8 }
  0xca   : > { %1149 = vmatprep.subr.bf16.mxu0 (!%p1065_p4), %v1631_v17 }
  0xcc   : > { %1146 = vmatmul.mubr.bf16.vlgmr.msra.gmra.mrb[0].mxu0 %v1362_v9 }
  0xcd   : > { %1165 = vmatprep.mubr.msk.bf16.mxu0 (!%p1065_p4), %vm1632_vm1, %v1631_v17  ;;  %1150 = vmatpush3.bf16.msra.mxu0 (!%p1065_p4), %v1954_v1 }
  0xce   : > { %1151 = vmatprep.subr.bf16.mxu0 (!%p1065_p4), %v1631_v17 }
  0xd1   : > { %1152 = vmatpush3.bf16.msra.mxu0 (!%p1065_p4), %v1959_v2 }
  0xd2   : > { %1153 = vmatprep.subr.bf16.mxu0 (!%p1065_p4), %v1631_v17 }
  0xd5   : > { %1154 = vmatpush3.bf16.msra.mxu0 (!%p1065_p4), %v1963_v3 }
  0xd6   : > { %1155 = vmatprep.subr.bf16.mxu0 (!%p1065_p4), %v1631_v17 }
  0xd9   : > { %1156 = vmatpush3.bf16.msra.mxu0 (!%p1065_p4), %v1968_v4 }
  0xda   : > { %1157 = vmatprep.subr.bf16.mxu0 (!%p1065_p4), %v1631_v17 }
  0xdd   : > { %1158 = vmatpush3.bf16.msra.mxu0 (!%p1065_p4), %v1972_v5 }
  0xde   : > { %1159 = vmatprep.subr.bf16.mxu0 (!%p1065_p4), %v1631_v17 }
  0xe1   : > { %1160 = vmatpush3.bf16.msra.mxu0 (!%p1065_p4), %v1976_v6 }
  0xe2   : > { %1161 = vmatprep.subr.bf16.mxu0 (!%p1065_p4), %v1631_v17 }
  0xe5   : > { %1162 = vmatpush3.bf16.msra.mxu0 (!%p1065_p4), %v1980_v7 }
  0xe6   : > { %1163 = vmatprep.subr.bf16.mxu0 (!%p1065_p4), %v1631_v17 }
  0xe9   : > { %1164 = vmatpush3.bf16.msra.mxu0 (!%p1065_p4), %v1984_v8 }
 0x19e   : > { %497 = sbr.rel (%p1065_p4) target bundleno = 633 (0x279), region = 68 }
 0x19f   : > { %v475_v11 = vpop.f32.mrb[0].mxu0 }
 0x1a0   : > { %v476_v12 = vadd.f32 %v1991_v10, %v475_v11  ;;  %v1147_v13 = vpop.f32.mrb[1].mxu0 }
 0x1a1   : > { %v478_v14 = vpop.f32.mrb[2].mxu0 }
 0x1a2   : > { %492 = vst [vmem:[#allocation2 + $0x11] sm:$0xff] %v476_v12  ;;  %v479_v15 = vadd.f32 %v1991_v10, %v478_v14  ;;  %v1148_v16 = vpop.f32.mrb[3].mxu0  ;;  %1166 = vmatmul.mubr.bf16.vlgmr.msra.gmra.mrb[0].mxu0 (!%p1065_p4), %v505_v18 }
 0x1a4   : > { %493 = vst [vmem:[#allocation2 + $0x21] sm:$0xff] %v479_v15 }
 0x275   : > { %v540_v19 = vpop.f32.mrb[0].mxu0 }
 0x276   : > { %v541_v20 = vadd.f32 %v1991_v10, %v540_v19  ;;  %v1167_v21 = vpop.f32.mrb[1].mxu0 }
 0x277   : > { %v543_v22 = vpop.f32.mrb[2].mxu0 }
 0x278   : > { %546 = vst [vmem:[#allocation2 + $0x1] sm:$0xff] %v541_v20  ;;  %v1168_v23 = vpop.f32.mrb[3].mxu0 }
 0x279 PF: > { %p1070_p3 = scmp.ge.s32.totalorder %s1603_s30, 3 }
 0x27a   : > { %v1633_v24 = vmov (!%p1070_p3), 0.0   ;;  %vm1634_vm2 = vmmov (!%p1070_p3), 0   ;;  %s1092_s3 = sadd.s32 (!%p1070_p3), 16, %s1053_s14 }
 0x27b   : > { %550 = sbr.rel (%p1070_p3) target bundleno = 882 (0x372), region = 72  ;;  %1169 = vmatprep.subr.bf16.mxu0 (!%p1070_p3), %v1633_v24  ;;  %1185 = vmatprep.mubr.msk.bf16.mxu0 (!%p1070_p3), %vm1634_vm2, %v1633_v24  ;;  %s553_s20 = sshra.s32 (!%p1070_p3), %s1092_s3, 3 }
 0x27c   : > { %1170 = vmatpush3.bf16.msra.mxu0 (!%p1070_p3), %v1954_v1  ;;  %s1072_s15 = sshll.u32 (!%p1070_p3), %s553_s20, 2 }
 0x27d   : > { %1171 = vmatprep.subr.bf16.mxu0 (!%p1070_p3), %v1633_v24  ;;  %s556_s16 = scalar_lea.vmem (!%p1070_p3), %s1923_s17, %s1072_s15 [#allocation3] }
 0x27e   : > { %v557_v25 = vld [vmem:[%s556_s16] sm:$0xf] (!%p1070_p3) }
 0x280   : > { %1172 = vmatpush3.bf16.msra.mxu0 (!%p1070_p3), %v1959_v2 }
 0x281   : > { %1173 = vmatprep.subr.bf16.mxu0 (!%p1070_p3), %v1633_v24 }
 0x284   : > { %1174 = vmatpush3.bf16.msra.mxu0 %v1963_v3 }
 0x285   : > { %1175 = vmatprep.subr.bf16.mxu0 %v1633_v24 }
 0x288   : > { %1176 = vmatpush3.bf16.msra.mxu0 %v1968_v4 }
 0x289   : > { %1177 = vmatprep.subr.bf16.mxu0 %v1633_v24 }
 0x28c   : > { %1178 = vmatpush3.bf16.msra.mxu0 %v1972_v5 }
 0x28d   : > { %1179 = vmatprep.subr.bf16.mxu0 %v1633_v24 }
 0x290   : > { %1180 = vmatpush3.bf16.msra.mxu0 %v1976_v6 }
 0x291   : > { %1181 = vmatprep.subr.bf16.mxu0 %v1633_v24 }
 0x294   : > { %1182 = vmatpush3.bf16.msra.mxu0 %v1980_v7 }
 0x295   : > { %1183 = vmatprep.subr.bf16.mxu0 %v1633_v24 }
 0x298   : > { %1184 = vmatpush3.bf16.msra.mxu0 %v1984_v8 }
 0x29b   : > { %1186 = vmatmul.mubr.bf16.vlgmr.msra.gmra.mrb[0].mxu0 %v557_v25 }
 0x36e   : > { %v592_v26 = vpop.f32.mrb[0].mxu0 }
 0x36f   : > { %v593_v27 = vadd.f32 %v1991_v10, %v592_v26  ;;  %v1187_v28 = vpop.f32.mrb[1].mxu0 }
 0x370   : > { %v595_v29 = vpop.f32.mrb[2].mxu0 }
 0x371   : > { %598 = vst [vmem:[#allocation2 + $0x31] sm:$0xff] %v593_v27  ;;  %v1188_v30 = vpop.f32.mrb[3].mxu0 }
 0x372 PF: > { %1189 = vmatprep.subr.bf16.mxu0 %v1629_v0  ;;  %v1363_v31 = vld [vmem:[#allocation9] sm:$0xff]   ;;  %1205 = vmatprep.mubr.msk.bf16.mxu0 %vm1630_vm0, %v1629_v0  ;;  %v616_v32 = vlaneseq  ;;  %v1364_v33 = vld [vmem:[#allocation9 + $0x8] sm:$0xff]   ;;  %v1365_v35 = vld [vmem:[#allocation9 + $0x10] sm:$0xff]   ;;  %vm636_vm3 = vcmask 1046528   ;;  %vm659_vm4 = vcmask 1045504   ;;  %s2198_s19 = sld [smem:[#allocation24_spill]] }
 0x373   : > { %1190 = vmatpush3.bf16.msra.mxu0 %v1363_v31  ;;  %v1366_v42 = vld [vmem:[#allocation9 + $0x18] sm:$0xff]   ;;  %v599_v43 = vld [vmem:[#allocation2] sm:$0xff]  ;;  %v601_v46 = vld [vmem:[#allocation2 + $0x10] sm:$0xff]  ;;  %s2199_s24 = sld [smem:[#allocation17_spill]]  ;;  %s1085_s6 = sshll.u32 %s1603_s30, 1 }
 0x374   : > { %v617_v34 = vshrl.u32 %v616_v32, 7  ;;  %1191 = vmatprep.subr.bf16.mxu0 %v1629_v0  ;;  %v600_v45 = vld [vmem:[#allocation2 + $0x8] sm:$0x3]  ;;  %v607_v47 = vld [vmem:[#allocation8] sm:$0xff]  ;;  %v602_v49 = vld [vmem:[#allocation2 + $0x18] sm:$0x3] }
 0x375   : > { %v1367_v63 = vld [vmem:[#allocation9 + $0x20] sm:$0xff]   ;;  %v2037_v9 = vld [vmem:[#allocation2 + $0x20] sm:$0xff]  ;;  %v1368_v18 = vld [vmem:[#allocation9 + $0x28] sm:$0xff]   ;;  %s2200_s7 = sld [smem:[#allocation26_spill]]  ;;  %s2201_s12 = sld [smem:[#allocation18_spill]] }
 0x376   : > { %v618_v36 = vsub.s32 0, %v617_v34  ;;  %v626_v37 = vsub.s32 1, %v617_v34  ;;  %v649_v38 = vsub.s32 2, %v617_v34  ;;  %v672_v39 = vsub.s32 3, %v617_v34  ;;  %v604_v19 = vld [vmem:[#allocation2 + $0x28] sm:$0x3] }
 0x377   : > { %1192 = vmatpush3.bf16.msra.mxu0 %v1364_v33  ;;  %v680_v40 = vsub.s32 4, %v617_v34  ;;  %v702_v41 = vsub.s32 5, %v617_v34  ;;  %v724_v44 = vsub.s32 6, %v617_v34  ;;  %v732_v48 = vsub.s32 7, %v617_v34  ;;  %s915_s18 = sshll.u32 %s1996_s8, 4  ;;  %s2202_s15 = sld [smem:[#allocation27_spill]]  ;;  %s2077_s18 = int_to_ptr.vmem [resolvable:$true] %s915_s18 }
 0x378   : > { %1193 = vmatprep.subr.bf16.mxu0 %v1629_v0  ;;  %v619_v50 = vrot.slane %v607_v47, %v618_v36  ;;  %v627_v51 = vrot.slane %v607_v47, %v626_v37  ;;  %v650_v52 = vrot.slane %v607_v47, %v649_v38  ;;  %v673_v53 = vrot.slane %v607_v47, %v672_v39  ;;  %v1073_v54 = vld [vmem:[%s2198_s19] ss:$0 sm:$0xff]  ;;  %s2083_s30 = scalar_lea.sflag [#allocation5], %s352_s5  ;;  %s1489_s17 = scalar_lea.vmem %s2077_s18, 256 }
 0x379   : > { %v681_v55 = vrot.slane %v607_v47, %v680_v40  ;;  %v703_v56 = vrot.slane %v607_v47, %v702_v41  ;;  %v2032_v57 = vrot.slane %v607_v47, %v724_v44  ;;  %v2034_v58 = vrot.slane %v607_v47, %v732_v48  ;;  %v1369_v36 = vld [vmem:[#allocation9 + $0x30] sm:$0xff]   ;;  %v605_v41 = vld [vmem:[#allocation2 + $0x30] sm:$0xff]  ;;  %s1086_s22 = sshll.u32 %s2199_s24, 3  ;;  %p1490_p7 = scmp.ne.s32.totalorder %s2077_s18, %s1489_s17 }
 0x37a   : > { %v620_v59 = vmul.f32 %v619_v50, %v599_v43  ;;  %v621_v60 = vmul.f32 %v619_v50, %v601_v46  ;;  %v628_v61 = vmul.f32 %v627_v51, %v599_v43  ;;  %v629_v62 = vmul.f32 %v627_v51, %v600_v45  ;;  %s912_s4 = sadd.s32 %s1086_s22, %s1085_s6  ;;  %s1635_s14 = smov [#allocation11]  }
 0x37b   : > { %1194 = vmatpush3.bf16.msra.mxu0 %v1365_v35  ;;  %v630_v1 = vmul.f32 %v627_v51, %v601_v46  ;;  %v631_v2 = vmul.f32 %v627_v51, %v602_v49  ;;  %v651_v3 = vmul.f32 %v650_v52, %v599_v43  ;;  %v652_v4 = vmul.f32 %v650_v52, %v600_v45  ;;  %v606_v51 = vld [vmem:[#allocation2 + $0x38] sm:$0x3]  ;;  %s1087_s27 = sshll.u32 %s912_s4, 7  ;;  %p2203_p9 = scmp.ne.s32.totalorder %s2201_s12, 0 }
 0x37c   : > { %1195 = vmatprep.subr.bf16.mxu0 %v1629_v0  ;;  %v622_v5 = vadd.f32 %v1073_v54, %v620_v59  ;;  %v623_v6 = vadd.f32 %v1073_v54, %v621_v60  ;;  %v637_v7 = vrot.slane %v628_v61, 1  ;;  %v638_v8 = vrot.slane %v629_v62, 1  ;;  %v1370_v59 = vld [vmem:[#allocation9 + $0x38] sm:$0xff]   ;;  %s1493_s19 = sshll.u32 %s1635_s14, 4  ;;  %s1494_s19 = int_to_ptr.vmem [resolvable:$false] %s1493_s19 }
 0x37d   : > { %v640_v10 = vrot.slane %v630_v1, 1  ;;  %v641_v11 = vrot.slane %v631_v2, 1  ;;  %v653_v12 = vmul.f32 %v650_v52, %v601_v46  ;;  %v654_v13 = vmul.f32 %v650_v52, %v602_v49  ;;  %v1074_v52 = vld [vmem:[#allocation8 + $0x8] ss:$0 sm:$0xff]  ;;  %s2075_s16 = scalar_lea.hbm %s2202_s15, %s1087_s27  ;;  %p1491_p13 = pnand %p1490_p7, %p2203_p9 }
 0x37e   : > { %v639_v14 = vsel %vm636_vm3, %v637_v7, %v638_v8  ;;  %v660_v15 = vrot.slane %v651_v3, 2  ;;  %v661_v16 = vrot.slane %v652_v4, 2  ;;  %v674_v17 = vmul.f32 %v673_v53, %v601_v46  ;;  %s1495_s24 = scalar_lea.vmem %s1494_s19, 512  ;;  %p1496_p0 = scmp.lt.s32.totalorder %s2077_s18, %s1494_s19 }
 0x37f   : > { %1196 = vmatpush3.bf16.msra.mxu0 %v1366_v42  ;;  %v642_v20 = vsel %vm636_vm3, %v640_v10, %v641_v11  ;;  %v645_v21 = vadd.f32 %v639_v14, %v622_v5  ;;  %v663_v22 = vrot.slane %v653_v12, 2  ;;  %v664_v23 = vrot.slane %v654_v13, 2  ;;  %p1492_p11 = pneg %p1491_p13  ;;  %p1497_p5 = scmp.lt.s32.totalorder %s1495_s24, %s1489_s17 }
 0x380   : > { %1197 = vmatprep.subr.bf16.mxu0 %v1629_v0  ;;  %v646_v24 = vadd.f32 %v642_v20, %v623_v6  ;;  %v662_v25 = vsel %vm659_vm4, %v660_v15, %v661_v16  ;;  %v675_v26 = vmul.f32 %v673_v53, %v2037_v9  ;;  %v682_v27 = vmul.f32 %v681_v55, %v601_v46 }
 0x381   : > { %v665_v28 = vsel %vm659_vm4, %v663_v22, %v664_v23  ;;  %v668_v29 = vadd.f32 %v662_v25, %v645_v21  ;;  %v683_v30 = vmul.f32 %v681_v55, %v602_v49  ;;  %v684_v31 = vmul.f32 %v681_v55, %v2037_v9  ;;  %p1498_p8 = por %p1497_p5, %p1496_p0 }
 0x382   : > { %v669_v32 = vadd.f32 %v665_v28, %v646_v24  ;;  %v685_v33 = vmul.f32 %v681_v55, %v604_v19  ;;  %v690_v34 = vrot.slane %v682_v27, 1  ;;  %v704_v35 = vmul.f32 %v703_v56, %v601_v46 }
 0x383   : > { %1198 = vmatpush3.bf16.msra.mxu0 %v1367_v63  ;;  %v676_v37 = vadd.f32 %v674_v17, %v668_v29  ;;  %v691_v38 = vrot.slane %v683_v30, 1  ;;  %v693_v39 = vrot.slane %v684_v31, 1  ;;  %v705_v40 = vmul.f32 %v703_v56, %v602_v49  ;;  %p1499_p12 = pnand %p1498_p8, %p1492_p11 }
 0x384   : > { %1199 = vmatprep.subr.bf16.mxu0 %v1629_v0  ;;  %v677_v42 = vadd.f32 %v675_v26, %v669_v32  ;;  %v694_v43 = vrot.slane %v685_v33, 1  ;;  %v706_v44 = vmul.f32 %v703_v56, %v2037_v9  ;;  %v707_v45 = vmul.f32 %v703_v56, %v604_v19 }
 0x385   : > { %v692_v47 = vsel %vm636_vm3, %v690_v34, %v691_v38  ;;  %v712_v48 = vrot.slane %v704_v35, 2  ;;  %v713_v50 = vrot.slane %v705_v40, 2  ;;  %v726_v46 = vmul.f32 %v2032_v57, %v2037_v9 }
 0x386   : > { %v695_v53 = vsel %vm636_vm3, %v693_v39, %v694_v43  ;;  %v698_v49 = vadd.f32 %v692_v47, %v676_v37  ;;  %v715_v54 = vrot.slane %v706_v44, 2  ;;  %v716_v55 = vrot.slane %v707_v45, 2 }
 0x387   : > { %1200 = vmatpush3.bf16.msra.mxu0 %v1368_v18  ;;  %v699_v60 = vadd.f32 %v695_v53, %v677_v42  ;;  %v714_v61 = vsel %vm659_vm4, %v712_v48, %v713_v50  ;;  %v727_v56 = vmul.f32 %v2032_v57, %v605_v41  ;;  %v734_v62 = vmul.f32 %v2034_v58, %v2037_v9 }
 0x388   : > { %1201 = vmatprep.subr.bf16.mxu0 %v1629_v0  ;;  %v717_v63 = vsel %vm659_vm4, %v715_v54, %v716_v55  ;;  %v720_v1 = vadd.f32 %v714_v61, %v698_v49  ;;  %v735_v2 = vmul.f32 %v2034_v58, %v604_v19  ;;  %v736_v3 = vmul.f32 %v2034_v58, %v605_v41 }
 0x389   : > { %v721_v4 = vadd.f32 %v717_v63, %v699_v60  ;;  %v737_v5 = vmul.f32 %v2034_v58, %v606_v51  ;;  %v742_v6 = vrot.slane %v734_v62, 1  ;;  %v756_v7 = vmul.f32 %v1074_v52, %v2037_v9 }
 0x38a   : > { %v728_v8 = vadd.f32 %v726_v46, %v720_v1  ;;  %v743_v57 = vrot.slane %v735_v2, 1  ;;  %v745_v10 = vrot.slane %v736_v3, 1  ;;  %v757_v11 = vmul.f32 %v1074_v52, %v604_v19 }
 0x38b   : > { %1202 = vmatpush3.bf16.msra.mxu0 %v1369_v36  ;;  %v729_v12 = vadd.f32 %v727_v56, %v721_v4  ;;  %v758_v13 = vmul.f32 %v1074_v52, %v605_v41  ;;  %v759_v14 = vmul.f32 %v1074_v52, %v606_v51  ;;  %v764_v16 = vrot.slane %v756_v7, 2  ;;  %v1075_v36 = vld [vmem:[%s2200_s7] ss:$0 sm:$0xff] }
 0x38c   : > { %1203 = vmatprep.subr.bf16.mxu0 %v1629_v0  ;;  %v746_v0 = vrot.slane %v737_v5, 1  ;;  %v744_v15 = vsel %vm636_vm3, %v742_v6, %v743_v57  ;;  %v765_v17 = vrot.slane %v757_v11, 2 }
 0x38d   : > { %v750_v20 = vadd.f32 %v744_v15, %v728_v8  ;;  %v767_v58 = vrot.slane %v758_v13, 2  ;;  %v768_v21 = vrot.slane %v759_v14, 2 }
 0x38e   : > { %v747_v18 = vsel %vm636_vm3, %v745_v10, %v746_v0  ;;  %v766_v9 = vsel %vm659_vm4, %v764_v16, %v765_v17 }
 0x38f   : > { %1204 = vmatpush3.bf16.msra.mxu0 %v1370_v59  ;;  %v751_v22 = vadd.f32 %v747_v18, %v729_v12  ;;  %v769_v23 = vsel %vm659_vm4, %v767_v58, %v768_v21  ;;  %v772_v19 = vadd.f32 %v766_v9, %v750_v20 }
 0x391   : > { %v773_v24 = vadd.f32 %v769_v23, %v751_v22  ;;  %v776_v25 = vmul.f32 0.70710677, %v772_v19  ;;  %v774_v27 = vmul.f32 0.5, %v772_v19 }
 0x393   : > { %v777_v26 = vmul.f32 0.70710677, %v773_v24  ;;  %1371 = verf.f32 %v776_v25  ;;  %v775_v29 = vmul.f32 0.5, %v773_v24 }
 0x395   : > { %1373 = verf.f32 %v777_v26 }
 0x39d   : > { %v1372_v28 = vpop.eup %1371 }
 0x39e   : > { %v780_v31 = vadd.f32 1.0, %v1372_v28 }
 0x39f   : > { %v1374_v30 = vpop.eup %1373 }
 0x3a0   : > { %v781_v32 = vadd.f32 1.0, %v1374_v30  ;;  %v782_v33 = vmul.f32 %v780_v31, %v774_v27 }
 0x3a2   : > { %v783_v34 = vmul.f32 %v781_v32, %v775_v29 }
 0x3a4   : > { %v784_v35 = vpack.c.bf16 %v783_v34, %v782_v33 }
 0x3a6   : > { %1206 = vmatmul.mubr.bf16.vlgmr.msra.gmra.mrb[0].mxu0 %v784_v35 }
 0x479   : > { %v890_v37 = vpop.f32.mrb[0].mxu0 }
 0x47a   : > { %v891_v38 = vadd.f32 %v1075_v36, %v890_v37  ;;  %v1207_v39 = vpop.f32.mrb[1].mxu0 }
 0x47b   : > { %v893_v40 = vpop.f32.mrb[2].mxu0 }
 0x47c   : > { %897 = vst [vmem:[%s1996_s8] sm:$0xff] %v891_v38  ;;  %v894_v41 = vadd.f32 %v1075_v36, %v893_v40  ;;  %v1208_v42 = vpop.f32.mrb[3].mxu0 }
 0x47e   : > { %898 = vst [vmem:[%s1996_s8 + $0x8] sm:$0xff] %v894_v41 }
 0x47f   : > { %1502 = shalt.err (!%p1499_p12)
}
 0x480   : > { %s1503_s5 = scalar_lea.hbm %s2075_s16, 256  ;;  %s1507_s22 = scalar_lea.hbm %s2202_s15, 2048 }
 0x481   : > { %p1504_p2 = scmp.ne.s32.totalorder %s2075_s16, %s1503_s5  ;;  %p1508_p1 = scmp.lt.u32.totalorder %s2075_s16, %s2202_s15 }
 0x482   : > { %p1509_p4 = scmp.lt.u32.totalorder %s1507_s22, %s1503_s5  ;;  %p1511_p7 = scmp.lt.u32.totalorder %s1503_s5, %s2075_s16 }
 0x483   : > { %p1505_p6 = pnand %p1504_p2, %p2203_p9 }
 0x484   : > { %p1510_p3 = por %p1509_p4, %p1508_p1 }
 0x485   : > { %p1506_p10 = pneg %p1505_p6 }
 0x486   : > { %p1512_p13 = por %p1511_p7, %p1510_p3 }
 0x488   : > { %p1513_p11 = pnand %p1512_p13, %p1506_p10 }
 0x48a   : > { %1516 = shalt.err (!%p1513_p11)
}
 0x48b   : > { %s1636_s23 = smov 128   ;;  %s1637_s7 = smov 8  }
 0x48c   : > { %1223 = dma.vmem_to_hbm [thread:$0]  (%p2203_p9), %s2077_s18, 256, %s2075_s16, %s2083_s30, %s1636_s23, %s1636_s23, %s1637_s7  }
 0x48d PF: > { %s2204_s27 = sld [smem:[#allocation16_spill]]  ;;  %s2205_s3 = sld [smem:[#allocation19_spill]] }
 0x48e   : > { %p1250_p0 = scmp.ge.s32.totalorder %s1619_s11, 2 }
 0x493   : > { %s930_s20 = sand.u32 1, %s2204_s27   ;;  %p2206_p5 = scmp.ne.s32.totalorder %s2205_s3, 0 }
 0x494   : > { %s931_s17 = scalar_lea.sflag [#allocation5], %s930_s20 }
 0x495   : > { %p1240_p8 = pnand %p1250_p0, %p2206_p5 }
 0x497   : > { %1574 = dma.done.wait (!%p1240_p8), %s931_s17, 256  }
 0x498   : > { %1576 = vsyncadd (!%p1240_p8), %s931_s17, 4294967040  ;;  %s25_s11 = sadd.s32 1, %s1619_s11   ;;  %s2207_s12 = sld [smem:[#allocation20_spill]] }
 0x499   : > { %p22_p12 = scmp.ge.s32.totalorder %s25_s11, 10   ;;  %s2208_s18 = sld [smem:[#allocation21_spill]] }
 0x49a   : > { %s2209_s24 = smov %s1583_s25  ;;  %s2210_s25 = smov %s1587_s26 }
 0x49b   : > { %s2211_s26 = smov %s1872_s1  ;;  %s2212_s27 = smov %s1595_s28 }
 0x49c   : > { %s2213_s28 = smov %s1599_s29  ;;  %s2214_s29 = smov %s1867_s21 }
 0x49d   : > { %s2215_s30 = smov %s1611_s9  ;;  %s2216_s8 = smov %s1615_s10 }
 0x49e   : > { %s2217_s9 = smov %s2207_s12  ;;  %24 = sbr.rel (!%p22_p12) target bundleno = 18 (0x12), region = 118 }
 0x49f   : > { %s2218_s10 = smov %s2208_s18 }
 0x4a5   :  { %936 = vsyncpa [#allocation4], 1 }
 0x4a6   :  { %938 = vsyncpa [#allocation4 + $0x1], 1 }
 0x4a7   :  { %939 = vsyncpa [#allocation7], 1 }
 0x4a8   :  { %940 = vsyncpa [#allocation10], 1 }
 0x4a9   :  { %941 = vsyncpa [#allocation5], 1 }
 0x4aa   :  { %943 = vsyncpa [#allocation5 + $0x1], 1 }

</bundles_post_ra>
